<compile_context>
chip_gen: v7x
topology: tpu7x:2x2x1
jax: 0.10.0
libtpu: 0.0.40
codegen_flags: <defaults>
</compile_context>

<pallas_src>
import math

import jax
import jax.numpy as jnp
from jax.experimental import pallas as pl
from jax.experimental.pallas import tpu as pltpu

# ----------------------------- small GPT-2 config -----------------------------
B, S = 2, 8            # batch, sequence
D = 32                 # hidden size
H = 2                  # heads
HD = D // H            # head dim
VOCAB = 64             # (tiny) logical vocab
VOCAB_PAD = 128        # lane-dense padded vocab; rows VOCAB..VOCAB+S-1 hold wpe
N_LAYER = 2            # transformer blocks
MLP = 4 * D            # MLP hidden (= 128)
EPS = 1e-5
M = B * S              # tokens per forward

BF16 = jnp.bfloat16
F32 = jnp.float32

# f32 slab row layout: 4 rows per layer + 1 final-LN row, padded to a 16-row
# sublane-aligned block, followed by the M additive-mask rows.
ROWS_PER_LAYER = 4
LN_ROWS = 16
MASK_ROW0 = LN_ROWS
F_SLAB_ROWS = LN_ROWS + M
assert ROWS_PER_LAYER * N_LAYER + 1 <= LN_ROWS


# ----------------------------- in-kernel helpers ------------------------------
def _layernorm(x, g, b):
    mu = jnp.mean(x, axis=-1, keepdims=True)
    xc = x - mu
    var = jnp.mean(xc * xc, axis=-1, keepdims=True)
    return xc * jax.lax.rsqrt(var + EPS) * g + b


def _gelu_new(x):  # GPT-2 "gelu_new" (tanh approximation)
    c = math.sqrt(2.0 / math.pi)
    return 0.5 * x * (1.0 + jnp.tanh(c * (x + 0.044715 * x * x * x)))


# ------------------------------- fused kernel ---------------------------------
def fused_gpt2_kernel(onehot_ref, w_ref, w2_ref, f_ref, out_ref):
    # Extended tied embedding table (rows: tokens | positions | zero pad),
    # bf16, loaded once and reused for the input embedding and the LM head.
    wte = w2_ref[0]                                               # [VP, D] bf16

    # token + position embedding in ONE MXU matmul: the input is a lane-dense
    # "two-hot" [M, VP] bf16 matrix (token row + position row both set to 1).
    x = jnp.dot(onehot_ref[...], wte, preferred_element_type=F32)  # [M, D] f32

    # static block-diagonal causal mask as an additive f32 bias (0 / -1e30),
    # precomputed at init — no in-kernel iota/div/mod/compare.
    mask_bias = f_ref[MASK_ROW0:MASK_ROW0 + M, 0:M]               # [M, M] f32

    for li in range(N_LAYER):
        base = li * ROWS_PER_LAYER
        ln_row = f_ref[base:base + 1, :]                          # [1, 128] f32
        ln1_g, ln1_b = ln_row[:, 0:D], ln_row[:, D:2 * D]
        ln2_g, ln2_b = ln_row[:, 2 * D:3 * D], ln_row[:, 3 * D:4 * D]
        b_row = f_ref[base + 1:base + 2, :]
        attn_b, proj_b = b_row[:, 0:3 * D], b_row[:, 3 * D:4 * D]
        fc_b = f_ref[base + 2:base + 3, :]                        # [1, MLP]
        fc2_b = f_ref[base + 3:base + 4, 0:D]                     # [1, D]

        wl = w_ref[li]                                            # [D, 8D] bf16
        attn_w = wl[:, 0:3 * D]        # 1/sqrt(HD) folded into q cols at init
        proj_w = wl[:, 3 * D:4 * D]
        fc_w = wl[:, 4 * D:8 * D]
        fc2_w = w2_ref[li + 1]                                    # [MLP, D] bf16

        # --------------------------- attention block --------------------------
        h = _layernorm(x, ln1_g, ln1_b)
        qkv = jnp.dot(h.astype(BF16), attn_w,
                      preferred_element_type=F32) + attn_b        # [M, 3D] f32
        q = qkv[:, 0:D]
        k = qkv[:, D:2 * D]
        v = qkv[:, 2 * D:3 * D]

        attn_out = proj_b                                         # [1, D]
        for hh in range(H):
            sl = slice(hh * HD, (hh + 1) * HD)
            scores = jax.lax.dot_general(
                q[:, sl].astype(BF16), k[:, sl].astype(BF16),
                (((1,), (1,)), ((), ())),
                preferred_element_type=F32)                       # [M, M] f32
            scores = scores + mask_bias                           # masking in f32
            smax = jnp.max(scores, axis=-1, keepdims=True)
            p = jnp.exp(scores - smax)
            denom = jnp.sum(p, axis=-1, keepdims=True)
            p = p * pl.reciprocal(denom, approx=False)            # exact softmax
            ho = jnp.dot(p.astype(BF16), v[:, sl].astype(BF16),
                         preferred_element_type=F32)              # [M, HD]
            # per-head output projection accumulated directly into [M, D]
            # (same MXU FLOPs, no lane-concatenate / relayout).
            attn_out = attn_out + jnp.dot(ho.astype(BF16), proj_w[sl, :],
                                          preferred_element_type=F32)
        x = x + attn_out

        # ------------------------------ MLP block ------------------------------
        h = _layernorm(x, ln2_g, ln2_b)
        h = jnp.dot(h.astype(BF16), fc_w, preferred_element_type=F32) + fc_b
        h = _gelu_new(h)
        h = jnp.dot(h.astype(BF16), fc2_w, preferred_element_type=F32) + fc2_b
        x = x + h

    # --- final LN + tied LM head: contract over D against the resident wte ---
    lnf_row = f_ref[ROWS_PER_LAYER * N_LAYER:ROWS_PER_LAYER * N_LAYER + 1, :]
    xf = _layernorm(x, lnf_row[:, 0:D], lnf_row[:, D:2 * D])
    logits = jax.lax.dot_general(
        xf.astype(BF16), wte,
        (((1,), (1,)), ((), ())), preferred_element_type=F32)     # [M, VP]
    out_ref[...] = logits.astype(out_ref.dtype)


# ------------------------------ model forward ---------------------------------
def gpt2_forward(params, input_ids):
    b, s = input_ids.shape
    assert (b, s) == (B, S)
    m = b * s
    ids = input_ids.reshape(m).astype(jnp.int32)
    pos = jnp.tile(jnp.arange(s, dtype=jnp.int32), (b,))
    # lane-dense "two-hot" MXU operand: token row + position row of the
    # extended embedding table (token ids < VOCAB, position rows live at
    # VOCAB..VOCAB+S-1, so the two indicators never collide).
    onehot = (jax.nn.one_hot(ids, VOCAB_PAD, dtype=BF16)
              + jax.nn.one_hot(VOCAB + pos, VOCAB_PAD, dtype=BF16))

    vmem = pl.BlockSpec(memory_space=pltpu.MemorySpace.VMEM)
    # Single fused grid-less call; all weights/activations (~0.2 MiB) stay
    # VMEM-resident.  NOTE: at real scale (D=768, vocab~50k) this would need a
    # tiled grid with a leading "parallel" batch axis (v7x: 2 TCs) — not here.
    logits = pl.pallas_call(
        fused_gpt2_kernel,
        out_shape=jax.ShapeDtypeStruct((m, VOCAB_PAD), jnp.float32),
        in_specs=[vmem, vmem, vmem, vmem],
        out_specs=vmem,
    )(onehot, params["w_slab"], params["w2_slab"], params["f_slab"])
    # logits columns >= VOCAB (zero-pad rows and wpe rows of the tied table)
    # are garbage/zero by construction and sliced off here.
    return logits.reshape(b, s, VOCAB_PAD)[:, :, :VOCAB]


# ------------------------------ parameter init ---------------------------------
def init_params(key):
    def nrm(k, shape, scale=0.02):
        return scale * jax.random.normal(k, shape, dtype=jnp.float32)

    keys = jax.random.split(key, 2 + N_LAYER)
    wte = nrm(keys[0], (VOCAB, D))
    wpe = nrm(keys[1], (S, D))
    # Extended embedding table: rows [0,VOCAB)=tokens, [VOCAB,VOCAB+S)=positions,
    # rest zero.  Also used (tied) as the LM head; extra columns are sliced off
    # in the wrapper.
    wte_ext = (jnp.zeros((VOCAB_PAD, D), jnp.float32)
               .at[:VOCAB].set(wte)
               .at[VOCAB:VOCAB + S].set(wpe))

    scale = 1.0 / math.sqrt(HD)
    w_rows = []                 # per-layer [D, 8D]: attn_w | proj_w | fc_w
    w2_rows = [wte_ext]         # [MLP(=VP), D] rows: wte_ext, then fc2_w per layer
    for li in range(N_LAYER):
        lk = jax.random.split(keys[2 + li], 4)
        attn_w = nrm(lk[0], (D, 3 * D))
        # fold 1/sqrt(HD) into q columns (init-time transform, no runtime cost)
        attn_w = attn_w.at[:, :D].multiply(scale)
        proj_w = nrm(lk[1], (D, D))
        fc_w = nrm(lk[2], (D, MLP))
        fc2_w = nrm(lk[3], (MLP, D))
        w_rows.append(jnp.concatenate([attn_w, proj_w, fc_w], axis=-1))
        w2_rows.append(fc2_w)

    w_slab = jnp.stack(w_rows).astype(BF16)        # [L, D, 8D] bf16
    w2_slab = jnp.stack(w2_rows).astype(BF16)      # [L+1, MLP, D] bf16

    # f32 slab: LN gammas/betas + matmul biases (f32) + additive causal mask.
    # Per-layer rows:
    #   base+0: ln1_g | ln1_b | ln2_g | ln2_b     (gamma=1, beta=0)
    #   base+1: attn_b | proj_b                   (zeros at init)
    #   base+2: fc_b                              (zeros)
    #   base+3: fc2_b | pad                       (zeros)
    # Row 4L: lnf_g | lnf_b | pad.  Rows MASK_ROW0..: block-diag causal bias.
    f_slab = jnp.zeros((F_SLAB_ROWS, 128), jnp.float32)
    for li in range(N_LAYER):
        base = ROWS_PER_LAYER * li
        f_slab = f_slab.at[base, 0:D].set(1.0)            # ln1_g
        f_slab = f_slab.at[base, 2 * D:3 * D].set(1.0)    # ln2_g
    f_slab = f_slab.at[ROWS_PER_LAYER * N_LAYER, 0:D].set(1.0)   # lnf_g

    r = jnp.arange(M)[:, None]
    c = jnp.arange(M)[None, :]
    keep = (r // S == c // S) & ((c % S) <= (r % S))
    mask_bias = jnp.where(keep, 0.0, -1e30).astype(jnp.float32)
    f_slab = f_slab.at[MASK_ROW0:MASK_ROW0 + M, 0:M].set(mask_bias)

    return {"w_slab": w_slab, "w2_slab": w2_slab, "f_slab": f_slab}


if __name__ == "__main__":
    key = jax.random.PRNGKey(0)
    pkey, ikey = jax.random.split(key)
    params = init_params(pkey)
    input_ids = jax.random.randint(ikey, (B, S), 0, VOCAB, dtype=jnp.int32)

    logits = jax.block_until_ready(gpt2_forward(params, input_ids))

    assert logits.shape == (B, S, VOCAB)
    assert logits.dtype == jnp.float32
    assert bool(jnp.all(jnp.isfinite(logits)))
    print("KERNEL_OK")
</pallas_src>

<mosaic_0001>
module attributes {stable_mosaic.version = 11 : i64} {
  func.func @fused_gpt2_kernel(%arg0: memref<16x128xbf16, #tpu.memory_space<vmem>>, %arg1: memref<2x32x256xbf16, #tpu.memory_space<vmem>>, %arg2: memref<3x128x32xbf16, #tpu.memory_space<vmem>>, %arg3: memref<32x128xf32, #tpu.memory_space<vmem>>, %arg4: memref<16x128xf32, #tpu.memory_space<vmem>>) attributes {dimension_semantics = [], scalar_prefetch = 0 : i64, scratch_operands = 0 : i64, tpu.core_type = #tpu.core_type<tc>} {
    %c0 = arith.constant 0 : index
    %c0_0 = arith.constant 0 : index
    %c0_1 = arith.constant 0 : index
    %0 = vector.load %arg2[%c0, %c0_0, %c0_1] : memref<3x128x32xbf16, #tpu.memory_space<vmem>>, vector<1x128x32xbf16>
    %1 = vector.shape_cast %0 : vector<1x128x32xbf16> to vector<128x32xbf16>
    %c0_2 = arith.constant 0 : index
    %c0_3 = arith.constant 0 : index
    %2 = vector.load %arg0[%c0_2, %c0_3] : memref<16x128xbf16, #tpu.memory_space<vmem>>, vector<16x128xbf16>
    %cst = arith.constant dense<0.000000e+00> : vector<16x32xf32>
    %3 = tpu.matmul %2, %1, %cst {dimension_numbers = #tpu.dot_dimension_numbers<[1], [0], [0], [1], [0, 0, 1, 1], [], []>} : vector<16x128xbf16>, vector<128x32xbf16>, vector<16x32xf32> -> vector<16x32xf32>
    %c16 = arith.constant 16 : index
    %c0_4 = arith.constant 0 : index
    %4 = vector.load %arg3[%c16, %c0_4] : memref<32x128xf32, #tpu.memory_space<vmem>>, vector<16x16xf32>
    %c0_5 = arith.constant 0 : index
    %c0_6 = arith.constant 0 : index
    %5 = vector.load %arg3[%c0_5, %c0_6] : memref<32x128xf32, #tpu.memory_space<vmem>>, vector<1x128xf32>
    %6 = vector.extract_strided_slice %5 {offsets = [0, 0], sizes = [1, 32], strides = [1, 1]} : vector<1x128xf32> to vector<1x32xf32>
    %7 = vector.extract_strided_slice %5 {offsets = [0, 32], sizes = [1, 32], strides = [1, 1]} : vector<1x128xf32> to vector<1x32xf32>
    %8 = vector.extract_strided_slice %5 {offsets = [0, 64], sizes = [1, 32], strides = [1, 1]} : vector<1x128xf32> to vector<1x32xf32>
    %9 = vector.extract_strided_slice %5 {offsets = [0, 96], sizes = [1, 32], strides = [1, 1]} : vector<1x128xf32> to vector<1x32xf32>
    %c1 = arith.constant 1 : index
    %c0_7 = arith.constant 0 : index
    %10 = vector.load %arg3[%c1, %c0_7] : memref<32x128xf32, #tpu.memory_space<vmem>>, vector<1x128xf32>
    %11 = vector.extract_strided_slice %10 {offsets = [0, 0], sizes = [1, 96], strides = [1, 1]} : vector<1x128xf32> to vector<1x96xf32>
    %12 = vector.extract_strided_slice %10 {offsets = [0, 96], sizes = [1, 32], strides = [1, 1]} : vector<1x128xf32> to vector<1x32xf32>
    %c2 = arith.constant 2 : index
    %c0_8 = arith.constant 0 : index
    %13 = vector.load %arg3[%c2, %c0_8] : memref<32x128xf32, #tpu.memory_space<vmem>>, vector<1x128xf32>
    %c3 = arith.constant 3 : index
    %c0_9 = arith.constant 0 : index
    %14 = vector.load %arg3[%c3, %c0_9] : memref<32x128xf32, #tpu.memory_space<vmem>>, vector<1x32xf32>
    %c0_10 = arith.constant 0 : index
    %c0_11 = arith.constant 0 : index
    %c0_12 = arith.constant 0 : index
    %15 = vector.load %arg1[%c0_10, %c0_11, %c0_12] : memref<2x32x256xbf16, #tpu.memory_space<vmem>>, vector<1x32x256xbf16>
    %16 = vector.shape_cast %15 : vector<1x32x256xbf16> to vector<32x256xbf16>
    %17 = vector.extract_strided_slice %16 {offsets = [0, 0], sizes = [32, 96], strides = [1, 1]} : vector<32x256xbf16> to vector<32x96xbf16>
    %18 = vector.extract_strided_slice %16 {offsets = [0, 96], sizes = [32, 32], strides = [1, 1]} : vector<32x256xbf16> to vector<32x32xbf16>
    %19 = vector.extract_strided_slice %16 {offsets = [0, 128], sizes = [32, 128], strides = [1, 1]} : vector<32x256xbf16> to vector<32x128xbf16>
    %c1_13 = arith.constant 1 : index
    %c0_14 = arith.constant 0 : index
    %c0_15 = arith.constant 0 : index
    %20 = vector.load %arg2[%c1_13, %c0_14, %c0_15] : memref<3x128x32xbf16, #tpu.memory_space<vmem>>, vector<1x128x32xbf16>
    %21 = vector.shape_cast %20 : vector<1x128x32xbf16> to vector<128x32xbf16>
    %cst_16 = arith.constant dense<0.000000e+00> : vector<16xf32>
    %22 = vector.multi_reduction <add>, %3, %cst_16 [1] : vector<16x32xf32> to vector<16xf32>
    %23 = vector.shape_cast %22 : vector<16xf32> to vector<16x1xf32>
    %cst_17 = arith.constant 3.200000e+01 : f32
    %24 = vector.broadcast %cst_17 : f32 to vector<16x1xf32>
    %25 = arith.divf %23, %24 : vector<16x1xf32>
    %26 = vector.broadcast %25 : vector<16x1xf32> to vector<16x32xf32>
    %27 = arith.subf %3, %26 : vector<16x32xf32>
    %28 = arith.mulf %27, %27 : vector<16x32xf32>
    %cst_18 = arith.constant dense<0.000000e+00> : vector<16xf32>
    %29 = vector.multi_reduction <add>, %28, %cst_18 [1] : vector<16x32xf32> to vector<16xf32>
    %30 = vector.shape_cast %29 : vector<16xf32> to vector<16x1xf32>
    %cst_19 = arith.constant 3.200000e+01 : f32
    %31 = vector.broadcast %cst_19 : f32 to vector<16x1xf32>
    %32 = arith.divf %30, %31 : vector<16x1xf32>
    %cst_20 = arith.constant 9.99999974E-6 : f32
    %33 = vector.broadcast %cst_20 : f32 to vector<16x1xf32>
    %34 = arith.addf %32, %33 : vector<16x1xf32>
    %35 = math.rsqrt %34 : vector<16x1xf32>
    %36 = vector.broadcast %35 : vector<16x1xf32> to vector<16x32xf32>
    %37 = arith.mulf %27, %36 : vector<16x32xf32>
    %38 = vector.broadcast %6 : vector<1x32xf32> to vector<16x32xf32>
    %39 = arith.mulf %37, %38 : vector<16x32xf32>
    %40 = vector.broadcast %7 : vector<1x32xf32> to vector<16x32xf32>
    %41 = arith.addf %39, %40 : vector<16x32xf32>
    %42 = arith.truncf %41 : vector<16x32xf32> to vector<16x32xbf16>
    %cst_21 = arith.constant dense<0.000000e+00> : vector<16x96xf32>
    %43 = tpu.matmul %42, %17, %cst_21 {dimension_numbers = #tpu.dot_dimension_numbers<[1], [0], [0], [1], [0, 0, 1, 1], [], []>} : vector<16x32xbf16>, vector<32x96xbf16>, vector<16x96xf32> -> vector<16x96xf32>
    %44 = vector.broadcast %11 : vector<1x96xf32> to vector<16x96xf32>
    %45 = arith.addf %43, %44 : vector<16x96xf32>
    %46 = vector.extract_strided_slice %45 {offsets = [0, 0], sizes = [16, 32], strides = [1, 1]} : vector<16x96xf32> to vector<16x32xf32>
    %47 = vector.extract_strided_slice %45 {offsets = [0, 32], sizes = [16, 32], strides = [1, 1]} : vector<16x96xf32> to vector<16x32xf32>
    %48 = vector.extract_strided_slice %45 {offsets = [0, 64], sizes = [16, 32], strides = [1, 1]} : vector<16x96xf32> to vector<16x32xf32>
    %49 = vector.extract_strided_slice %46 {offsets = [0, 0], sizes = [16, 16], strides = [1, 1]} : vector<16x32xf32> to vector<16x16xf32>
    %50 = arith.truncf %49 : vector<16x16xf32> to vector<16x16xbf16>
    %51 = vector.extract_strided_slice %47 {offsets = [0, 0], sizes = [16, 16], strides = [1, 1]} : vector<16x32xf32> to vector<16x16xf32>
    %52 = arith.truncf %51 : vector<16x16xf32> to vector<16x16xbf16>
    %cst_22 = arith.constant dense<0.000000e+00> : vector<16x16xf32>
    %53 = tpu.matmul %50, %52, %cst_22 {dimension_numbers = #tpu.dot_dimension_numbers<[1], [1], [0], [0], [0, 0, 1, 0], [], []>} : vector<16x16xbf16>, vector<16x16xbf16>, vector<16x16xf32> -> vector<16x16xf32>
    %54 = arith.addf %53, %4 : vector<16x16xf32>
    %cst_23 = arith.constant dense<0xFF800000> : vector<16xf32>
    %55 = vector.multi_reduction <maximumf>, %54, %cst_23 [1] : vector<16x16xf32> to vector<16xf32>
    %56 = vector.shape_cast %55 : vector<16xf32> to vector<16x1xf32>
    %57 = vector.broadcast %56 : vector<16x1xf32> to vector<16x16xf32>
    %58 = arith.subf %54, %57 : vector<16x16xf32>
    %59 = math.exp %58 : vector<16x16xf32>
    %cst_24 = arith.constant dense<0.000000e+00> : vector<16xf32>
    %60 = vector.multi_reduction <add>, %59, %cst_24 [1] : vector<16x16xf32> to vector<16xf32>
    %61 = vector.shape_cast %60 : vector<16xf32> to vector<16x1xf32>
    %62 = tpu.reciprocal %61 : vector<16x1xf32> -> vector<16x1xf32>
    %63 = vector.broadcast %62 : vector<16x1xf32> to vector<16x16xf32>
    %64 = arith.mulf %59, %63 : vector<16x16xf32>
    %65 = arith.truncf %64 : vector<16x16xf32> to vector<16x16xbf16>
    %66 = vector.extract_strided_slice %48 {offsets = [0, 0], sizes = [16, 16], strides = [1, 1]} : vector<16x32xf32> to vector<16x16xf32>
    %67 = arith.truncf %66 : vector<16x16xf32> to vector<16x16xbf16>
    %cst_25 = arith.constant dense<0.000000e+00> : vector<16x16xf32>
    %68 = tpu.matmul %65, %67, %cst_25 {dimension_numbers = #tpu.dot_dimension_numbers<[1], [0], [0], [1], [0, 0, 1, 1], [], []>} : vector<16x16xbf16>, vector<16x16xbf16>, vector<16x16xf32> -> vector<16x16xf32>
    %69 = arith.truncf %68 : vector<16x16xf32> to vector<16x16xbf16>
    %70 = vector.extract_strided_slice %18 {offsets = [0, 0], sizes = [16, 32], strides = [1, 1]} : vector<32x32xbf16> to vector<16x32xbf16>
    %cst_26 = arith.constant dense<0.000000e+00> : vector<16x32xf32>
    %71 = tpu.matmul %69, %70, %cst_26 {dimension_numbers = #tpu.dot_dimension_numbers<[1], [0], [0], [1], [0, 0, 1, 1], [], []>} : vector<16x16xbf16>, vector<16x32xbf16>, vector<16x32xf32> -> vector<16x32xf32>
    %72 = vector.broadcast %12 : vector<1x32xf32> to vector<16x32xf32>
    %73 = arith.addf %72, %71 : vector<16x32xf32>
    %74 = vector.extract_strided_slice %46 {offsets = [0, 16], sizes = [16, 16], strides = [1, 1]} : vector<16x32xf32> to vector<16x16xf32>
    %75 = arith.truncf %74 : vector<16x16xf32> to vector<16x16xbf16>
    %76 = vector.extract_strided_slice %47 {offsets = [0, 16], sizes = [16, 16], strides = [1, 1]} : vector<16x32xf32> to vector<16x16xf32>
    %77 = arith.truncf %76 : vector<16x16xf32> to vector<16x16xbf16>
    %cst_27 = arith.constant dense<0.000000e+00> : vector<16x16xf32>
    %78 = tpu.matmul %75, %77, %cst_27 {dimension_numbers = #tpu.dot_dimension_numbers<[1], [1], [0], [0], [0, 0, 1, 0], [], []>} : vector<16x16xbf16>, vector<16x16xbf16>, vector<16x16xf32> -> vector<16x16xf32>
    %79 = arith.addf %78, %4 : vector<16x16xf32>
    %cst_28 = arith.constant dense<0xFF800000> : vector<16xf32>
    %80 = vector.multi_reduction <maximumf>, %79, %cst_28 [1] : vector<16x16xf32> to vector<16xf32>
    %81 = vector.shape_cast %80 : vector<16xf32> to vector<16x1xf32>
    %82 = vector.broadcast %81 : vector<16x1xf32> to vector<16x16xf32>
    %83 = arith.subf %79, %82 : vector<16x16xf32>
    %84 = math.exp %83 : vector<16x16xf32>
    %cst_29 = arith.constant dense<0.000000e+00> : vector<16xf32>
    %85 = vector.multi_reduction <add>, %84, %cst_29 [1] : vector<16x16xf32> to vector<16xf32>
    %86 = vector.shape_cast %85 : vector<16xf32> to vector<16x1xf32>
    %87 = tpu.reciprocal %86 : vector<16x1xf32> -> vector<16x1xf32>
    %88 = vector.broadcast %87 : vector<16x1xf32> to vector<16x16xf32>
    %89 = arith.mulf %84, %88 : vector<16x16xf32>
    %90 = arith.truncf %89 : vector<16x16xf32> to vector<16x16xbf16>
    %91 = vector.extract_strided_slice %48 {offsets = [0, 16], sizes = [16, 16], strides = [1, 1]} : vector<16x32xf32> to vector<16x16xf32>
    %92 = arith.truncf %91 : vector<16x16xf32> to vector<16x16xbf16>
    %cst_30 = arith.constant dense<0.000000e+00> : vector<16x16xf32>
    %93 = tpu.matmul %90, %92, %cst_30 {dimension_numbers = #tpu.dot_dimension_numbers<[1], [0], [0], [1], [0, 0, 1, 1], [], []>} : vector<16x16xbf16>, vector<16x16xbf16>, vector<16x16xf32> -> vector<16x16xf32>
    %94 = arith.truncf %93 : vector<16x16xf32> to vector<16x16xbf16>
    %95 = vector.extract_strided_slice %18 {offsets = [16, 0], sizes = [16, 32], strides = [1, 1]} : vector<32x32xbf16> to vector<16x32xbf16>
    %cst_31 = arith.constant dense<0.000000e+00> : vector<16x32xf32>
    %96 = tpu.matmul %94, %95, %cst_31 {dimension_numbers = #tpu.dot_dimension_numbers<[1], [0], [0], [1], [0, 0, 1, 1], [], []>} : vector<16x16xbf16>, vector<16x32xbf16>, vector<16x32xf32> -> vector<16x32xf32>
    %97 = arith.addf %73, %96 : vector<16x32xf32>
    %98 = arith.addf %3, %97 : vector<16x32xf32>
    %cst_32 = arith.constant dense<0.000000e+00> : vector<16xf32>
    %99 = vector.multi_reduction <add>, %98, %cst_32 [1] : vector<16x32xf32> to vector<16xf32>
    %100 = vector.shape_cast %99 : vector<16xf32> to vector<16x1xf32>
    %cst_33 = arith.constant 3.200000e+01 : f32
    %101 = vector.broadcast %cst_33 : f32 to vector<16x1xf32>
    %102 = arith.divf %100, %101 : vector<16x1xf32>
    %103 = vector.broadcast %102 : vector<16x1xf32> to vector<16x32xf32>
    %104 = arith.subf %98, %103 : vector<16x32xf32>
    %105 = arith.mulf %104, %104 : vector<16x32xf32>
    %cst_34 = arith.constant dense<0.000000e+00> : vector<16xf32>
    %106 = vector.multi_reduction <add>, %105, %cst_34 [1] : vector<16x32xf32> to vector<16xf32>
    %107 = vector.shape_cast %106 : vector<16xf32> to vector<16x1xf32>
    %cst_35 = arith.constant 3.200000e+01 : f32
    %108 = vector.broadcast %cst_35 : f32 to vector<16x1xf32>
    %109 = arith.divf %107, %108 : vector<16x1xf32>
    %cst_36 = arith.constant 9.99999974E-6 : f32
    %110 = vector.broadcast %cst_36 : f32 to vector<16x1xf32>
    %111 = arith.addf %109, %110 : vector<16x1xf32>
    %112 = math.rsqrt %111 : vector<16x1xf32>
    %113 = vector.broadcast %112 : vector<16x1xf32> to vector<16x32xf32>
    %114 = arith.mulf %104, %113 : vector<16x32xf32>
    %115 = vector.broadcast %8 : vector<1x32xf32> to vector<16x32xf32>
    %116 = arith.mulf %114, %115 : vector<16x32xf32>
    %117 = vector.broadcast %9 : vector<1x32xf32> to vector<16x32xf32>
    %118 = arith.addf %116, %117 : vector<16x32xf32>
    %119 = arith.truncf %118 : vector<16x32xf32> to vector<16x32xbf16>
    %cst_37 = arith.constant dense<0.000000e+00> : vector<16x128xf32>
    %120 = tpu.matmul %119, %19, %cst_37 {dimension_numbers = #tpu.dot_dimension_numbers<[1], [0], [0], [1], [0, 0, 1, 1], [], []>} : vector<16x32xbf16>, vector<32x128xbf16>, vector<16x128xf32> -> vector<16x128xf32>
    %121 = vector.broadcast %13 : vector<1x128xf32> to vector<16x128xf32>
    %122 = arith.addf %120, %121 : vector<16x128xf32>
    %cst_38 = arith.constant 5.000000e-01 : f32
    %123 = vector.broadcast %cst_38 : f32 to vector<16x128xf32>
    %124 = arith.mulf %123, %122 : vector<16x128xf32>
    %cst_39 = arith.constant 4.471500e-02 : f32
    %125 = vector.broadcast %cst_39 : f32 to vector<16x128xf32>
    %126 = arith.mulf %125, %122 : vector<16x128xf32>
    %127 = arith.mulf %126, %122 : vector<16x128xf32>
    %128 = arith.mulf %127, %122 : vector<16x128xf32>
    %129 = arith.addf %122, %128 : vector<16x128xf32>
    %cst_40 = arith.constant 0.797884583 : f32
    %130 = vector.broadcast %cst_40 : f32 to vector<16x128xf32>
    %131 = arith.mulf %130, %129 : vector<16x128xf32>
    %132 = math.tanh %131 : vector<16x128xf32>
    %cst_41 = arith.constant 1.000000e+00 : f32
    %133 = vector.broadcast %cst_41 : f32 to vector<16x128xf32>
    %134 = arith.addf %133, %132 : vector<16x128xf32>
    %135 = arith.mulf %124, %134 : vector<16x128xf32>
    %136 = arith.truncf %135 : vector<16x128xf32> to vector<16x128xbf16>
    %cst_42 = arith.constant dense<0.000000e+00> : vector<16x32xf32>
    %137 = tpu.matmul %136, %21, %cst_42 {dimension_numbers = #tpu.dot_dimension_numbers<[1], [0], [0], [1], [0, 0, 1, 1], [], []>} : vector<16x128xbf16>, vector<128x32xbf16>, vector<16x32xf32> -> vector<16x32xf32>
    %138 = vector.broadcast %14 : vector<1x32xf32> to vector<16x32xf32>
    %139 = arith.addf %137, %138 : vector<16x32xf32>
    %140 = arith.addf %98, %139 : vector<16x32xf32>
    %c4 = arith.constant 4 : index
    %c0_43 = arith.constant 0 : index
    %141 = vector.load %arg3[%c4, %c0_43] : memref<32x128xf32, #tpu.memory_space<vmem>>, vector<1x128xf32>
    %142 = vector.extract_strided_slice %141 {offsets = [0, 0], sizes = [1, 32], strides = [1, 1]} : vector<1x128xf32> to vector<1x32xf32>
    %143 = vector.extract_strided_slice %141 {offsets = [0, 32], sizes = [1, 32], strides = [1, 1]} : vector<1x128xf32> to vector<1x32xf32>
    %144 = vector.extract_strided_slice %141 {offsets = [0, 64], sizes = [1, 32], strides = [1, 1]} : vector<1x128xf32> to vector<1x32xf32>
    %145 = vector.extract_strided_slice %141 {offsets = [0, 96], sizes = [1, 32], strides = [1, 1]} : vector<1x128xf32> to vector<1x32xf32>
    %c5 = arith.constant 5 : index
    %c0_44 = arith.constant 0 : index
    %146 = vector.load %arg3[%c5, %c0_44] : memref<32x128xf32, #tpu.memory_space<vmem>>, vector<1x128xf32>
    %147 = vector.extract_strided_slice %146 {offsets = [0, 0], sizes = [1, 96], strides = [1, 1]} : vector<1x128xf32> to vector<1x96xf32>
    %148 = vector.extract_strided_slice %146 {offsets = [0, 96], sizes = [1, 32], strides = [1, 1]} : vector<1x128xf32> to vector<1x32xf32>
    %c6 = arith.constant 6 : index
    %c0_45 = arith.constant 0 : index
    %149 = vector.load %arg3[%c6, %c0_45] : memref<32x128xf32, #tpu.memory_space<vmem>>, vector<1x128xf32>
    %c7 = arith.constant 7 : index
    %c0_46 = arith.constant 0 : index
    %150 = vector.load %arg3[%c7, %c0_46] : memref<32x128xf32, #tpu.memory_space<vmem>>, vector<1x32xf32>
    %c1_47 = arith.constant 1 : index
    %c0_48 = arith.constant 0 : index
    %c0_49 = arith.constant 0 : index
    %151 = vector.load %arg1[%c1_47, %c0_48, %c0_49] : memref<2x32x256xbf16, #tpu.memory_space<vmem>>, vector<1x32x256xbf16>
    %152 = vector.shape_cast %151 : vector<1x32x256xbf16> to vector<32x256xbf16>
    %153 = vector.extract_strided_slice %152 {offsets = [0, 0], sizes = [32, 96], strides = [1, 1]} : vector<32x256xbf16> to vector<32x96xbf16>
    %154 = vector.extract_strided_slice %152 {offsets = [0, 96], sizes = [32, 32], strides = [1, 1]} : vector<32x256xbf16> to vector<32x32xbf16>
    %155 = vector.extract_strided_slice %152 {offsets = [0, 128], sizes = [32, 128], strides = [1, 1]} : vector<32x256xbf16> to vector<32x128xbf16>
    %c2_50 = arith.constant 2 : index
    %c0_51 = arith.constant 0 : index
    %c0_52 = arith.constant 0 : index
    %156 = vector.load %arg2[%c2_50, %c0_51, %c0_52] : memref<3x128x32xbf16, #tpu.memory_space<vmem>>, vector<1x128x32xbf16>
    %157 = vector.shape_cast %156 : vector<1x128x32xbf16> to vector<128x32xbf16>
    %cst_53 = arith.constant dense<0.000000e+00> : vector<16xf32>
    %158 = vector.multi_reduction <add>, %140, %cst_53 [1] : vector<16x32xf32> to vector<16xf32>
    %159 = vector.shape_cast %158 : vector<16xf32> to vector<16x1xf32>
    %cst_54 = arith.constant 3.200000e+01 : f32
    %160 = vector.broadcast %cst_54 : f32 to vector<16x1xf32>
    %161 = arith.divf %159, %160 : vector<16x1xf32>
    %162 = vector.broadcast %161 : vector<16x1xf32> to vector<16x32xf32>
    %163 = arith.subf %140, %162 : vector<16x32xf32>
    %164 = arith.mulf %163, %163 : vector<16x32xf32>
    %cst_55 = arith.constant dense<0.000000e+00> : vector<16xf32>
    %165 = vector.multi_reduction <add>, %164, %cst_55 [1] : vector<16x32xf32> to vector<16xf32>
    %166 = vector.shape_cast %165 : vector<16xf32> to vector<16x1xf32>
    %cst_56 = arith.constant 3.200000e+01 : f32
    %167 = vector.broadcast %cst_56 : f32 to vector<16x1xf32>
    %168 = arith.divf %166, %167 : vector<16x1xf32>
    %cst_57 = arith.constant 9.99999974E-6 : f32
    %169 = vector.broadcast %cst_57 : f32 to vector<16x1xf32>
    %170 = arith.addf %168, %169 : vector<16x1xf32>
    %171 = math.rsqrt %170 : vector<16x1xf32>
    %172 = vector.broadcast %171 : vector<16x1xf32> to vector<16x32xf32>
    %173 = arith.mulf %163, %172 : vector<16x32xf32>
    %174 = vector.broadcast %142 : vector<1x32xf32> to vector<16x32xf32>
    %175 = arith.mulf %173, %174 : vector<16x32xf32>
    %176 = vector.broadcast %143 : vector<1x32xf32> to vector<16x32xf32>
    %177 = arith.addf %175, %176 : vector<16x32xf32>
    %178 = arith.truncf %177 : vector<16x32xf32> to vector<16x32xbf16>
    %cst_58 = arith.constant dense<0.000000e+00> : vector<16x96xf32>
    %179 = tpu.matmul %178, %153, %cst_58 {dimension_numbers = #tpu.dot_dimension_numbers<[1], [0], [0], [1], [0, 0, 1, 1], [], []>} : vector<16x32xbf16>, vector<32x96xbf16>, vector<16x96xf32> -> vector<16x96xf32>
    %180 = vector.broadcast %147 : vector<1x96xf32> to vector<16x96xf32>
    %181 = arith.addf %179, %180 : vector<16x96xf32>
    %182 = vector.extract_strided_slice %181 {offsets = [0, 0], sizes = [16, 32], strides = [1, 1]} : vector<16x96xf32> to vector<16x32xf32>
    %183 = vector.extract_strided_slice %181 {offsets = [0, 32], sizes = [16, 32], strides = [1, 1]} : vector<16x96xf32> to vector<16x32xf32>
    %184 = vector.extract_strided_slice %181 {offsets = [0, 64], sizes = [16, 32], strides = [1, 1]} : vector<16x96xf32> to vector<16x32xf32>
    %185 = vector.extract_strided_slice %182 {offsets = [0, 0], sizes = [16, 16], strides = [1, 1]} : vector<16x32xf32> to vector<16x16xf32>
    %186 = arith.truncf %185 : vector<16x16xf32> to vector<16x16xbf16>
    %187 = vector.extract_strided_slice %183 {offsets = [0, 0], sizes = [16, 16], strides = [1, 1]} : vector<16x32xf32> to vector<16x16xf32>
    %188 = arith.truncf %187 : vector<16x16xf32> to vector<16x16xbf16>
    %cst_59 = arith.constant dense<0.000000e+00> : vector<16x16xf32>
    %189 = tpu.matmul %186, %188, %cst_59 {dimension_numbers = #tpu.dot_dimension_numbers<[1], [1], [0], [0], [0, 0, 1, 0], [], []>} : vector<16x16xbf16>, vector<16x16xbf16>, vector<16x16xf32> -> vector<16x16xf32>
    %190 = arith.addf %189, %4 : vector<16x16xf32>
    %cst_60 = arith.constant dense<0xFF800000> : vector<16xf32>
    %191 = vector.multi_reduction <maximumf>, %190, %cst_60 [1] : vector<16x16xf32> to vector<16xf32>
    %192 = vector.shape_cast %191 : vector<16xf32> to vector<16x1xf32>
    %193 = vector.broadcast %192 : vector<16x1xf32> to vector<16x16xf32>
    %194 = arith.subf %190, %193 : vector<16x16xf32>
    %195 = math.exp %194 : vector<16x16xf32>
    %cst_61 = arith.constant dense<0.000000e+00> : vector<16xf32>
    %196 = vector.multi_reduction <add>, %195, %cst_61 [1] : vector<16x16xf32> to vector<16xf32>
    %197 = vector.shape_cast %196 : vector<16xf32> to vector<16x1xf32>
    %198 = tpu.reciprocal %197 : vector<16x1xf32> -> vector<16x1xf32>
    %199 = vector.broadcast %198 : vector<16x1xf32> to vector<16x16xf32>
    %200 = arith.mulf %195, %199 : vector<16x16xf32>
    %201 = arith.truncf %200 : vector<16x16xf32> to vector<16x16xbf16>
    %202 = vector.extract_strided_slice %184 {offsets = [0, 0], sizes = [16, 16], strides = [1, 1]} : vector<16x32xf32> to vector<16x16xf32>
    %203 = arith.truncf %202 : vector<16x16xf32> to vector<16x16xbf16>
    %cst_62 = arith.constant dense<0.000000e+00> : vector<16x16xf32>
    %204 = tpu.matmul %201, %203, %cst_62 {dimension_numbers = #tpu.dot_dimension_numbers<[1], [0], [0], [1], [0, 0, 1, 1], [], []>} : vector<16x16xbf16>, vector<16x16xbf16>, vector<16x16xf32> -> vector<16x16xf32>
    %205 = arith.truncf %204 : vector<16x16xf32> to vector<16x16xbf16>
    %206 = vector.extract_strided_slice %154 {offsets = [0, 0], sizes = [16, 32], strides = [1, 1]} : vector<32x32xbf16> to vector<16x32xbf16>
    %cst_63 = arith.constant dense<0.000000e+00> : vector<16x32xf32>
    %207 = tpu.matmul %205, %206, %cst_63 {dimension_numbers = #tpu.dot_dimension_numbers<[1], [0], [0], [1], [0, 0, 1, 1], [], []>} : vector<16x16xbf16>, vector<16x32xbf16>, vector<16x32xf32> -> vector<16x32xf32>
    %208 = vector.broadcast %148 : vector<1x32xf32> to vector<16x32xf32>
    %209 = arith.addf %208, %207 : vector<16x32xf32>
    %210 = vector.extract_strided_slice %182 {offsets = [0, 16], sizes = [16, 16], strides = [1, 1]} : vector<16x32xf32> to vector<16x16xf32>
    %211 = arith.truncf %210 : vector<16x16xf32> to vector<16x16xbf16>
    %212 = vector.extract_strided_slice %183 {offsets = [0, 16], sizes = [16, 16], strides = [1, 1]} : vector<16x32xf32> to vector<16x16xf32>
    %213 = arith.truncf %212 : vector<16x16xf32> to vector<16x16xbf16>
    %cst_64 = arith.constant dense<0.000000e+00> : vector<16x16xf32>
    %214 = tpu.matmul %211, %213, %cst_64 {dimension_numbers = #tpu.dot_dimension_numbers<[1], [1], [0], [0], [0, 0, 1, 0], [], []>} : vector<16x16xbf16>, vector<16x16xbf16>, vector<16x16xf32> -> vector<16x16xf32>
    %215 = arith.addf %214, %4 : vector<16x16xf32>
    %cst_65 = arith.constant dense<0xFF800000> : vector<16xf32>
    %216 = vector.multi_reduction <maximumf>, %215, %cst_65 [1] : vector<16x16xf32> to vector<16xf32>
    %217 = vector.shape_cast %216 : vector<16xf32> to vector<16x1xf32>
    %218 = vector.broadcast %217 : vector<16x1xf32> to vector<16x16xf32>
    %219 = arith.subf %215, %218 : vector<16x16xf32>
    %220 = math.exp %219 : vector<16x16xf32>
    %cst_66 = arith.constant dense<0.000000e+00> : vector<16xf32>
    %221 = vector.multi_reduction <add>, %220, %cst_66 [1] : vector<16x16xf32> to vector<16xf32>
    %222 = vector.shape_cast %221 : vector<16xf32> to vector<16x1xf32>
    %223 = tpu.reciprocal %222 : vector<16x1xf32> -> vector<16x1xf32>
    %224 = vector.broadcast %223 : vector<16x1xf32> to vector<16x16xf32>
    %225 = arith.mulf %220, %224 : vector<16x16xf32>
    %226 = arith.truncf %225 : vector<16x16xf32> to vector<16x16xbf16>
    %227 = vector.extract_strided_slice %184 {offsets = [0, 16], sizes = [16, 16], strides = [1, 1]} : vector<16x32xf32> to vector<16x16xf32>
    %228 = arith.truncf %227 : vector<16x16xf32> to vector<16x16xbf16>
    %cst_67 = arith.constant dense<0.000000e+00> : vector<16x16xf32>
    %229 = tpu.matmul %226, %228, %cst_67 {dimension_numbers = #tpu.dot_dimension_numbers<[1], [0], [0], [1], [0, 0, 1, 1], [], []>} : vector<16x16xbf16>, vector<16x16xbf16>, vector<16x16xf32> -> vector<16x16xf32>
    %230 = arith.truncf %229 : vector<16x16xf32> to vector<16x16xbf16>
    %231 = vector.extract_strided_slice %154 {offsets = [16, 0], sizes = [16, 32], strides = [1, 1]} : vector<32x32xbf16> to vector<16x32xbf16>
    %cst_68 = arith.constant dense<0.000000e+00> : vector<16x32xf32>
    %232 = tpu.matmul %230, %231, %cst_68 {dimension_numbers = #tpu.dot_dimension_numbers<[1], [0], [0], [1], [0, 0, 1, 1], [], []>} : vector<16x16xbf16>, vector<16x32xbf16>, vector<16x32xf32> -> vector<16x32xf32>
    %233 = arith.addf %209, %232 : vector<16x32xf32>
    %234 = arith.addf %140, %233 : vector<16x32xf32>
    %cst_69 = arith.constant dense<0.000000e+00> : vector<16xf32>
    %235 = vector.multi_reduction <add>, %234, %cst_69 [1] : vector<16x32xf32> to vector<16xf32>
    %236 = vector.shape_cast %235 : vector<16xf32> to vector<16x1xf32>
    %cst_70 = arith.constant 3.200000e+01 : f32
    %237 = vector.broadcast %cst_70 : f32 to vector<16x1xf32>
    %238 = arith.divf %236, %237 : vector<16x1xf32>
    %239 = vector.broadcast %238 : vector<16x1xf32> to vector<16x32xf32>
    %240 = arith.subf %234, %239 : vector<16x32xf32>
    %241 = arith.mulf %240, %240 : vector<16x32xf32>
    %cst_71 = arith.constant dense<0.000000e+00> : vector<16xf32>
    %242 = vector.multi_reduction <add>, %241, %cst_71 [1] : vector<16x32xf32> to vector<16xf32>
    %243 = vector.shape_cast %242 : vector<16xf32> to vector<16x1xf32>
    %cst_72 = arith.constant 3.200000e+01 : f32
    %244 = vector.broadcast %cst_72 : f32 to vector<16x1xf32>
    %245 = arith.divf %243, %244 : vector<16x1xf32>
    %cst_73 = arith.constant 9.99999974E-6 : f32
    %246 = vector.broadcast %cst_73 : f32 to vector<16x1xf32>
    %247 = arith.addf %245, %246 : vector<16x1xf32>
    %248 = math.rsqrt %247 : vector<16x1xf32>
    %249 = vector.broadcast %248 : vector<16x1xf32> to vector<16x32xf32>
    %250 = arith.mulf %240, %249 : vector<16x32xf32>
    %251 = vector.broadcast %144 : vector<1x32xf32> to vector<16x32xf32>
    %252 = arith.mulf %250, %251 : vector<16x32xf32>
    %253 = vector.broadcast %145 : vector<1x32xf32> to vector<16x32xf32>
    %254 = arith.addf %252, %253 : vector<16x32xf32>
    %255 = arith.truncf %254 : vector<16x32xf32> to vector<16x32xbf16>
    %cst_74 = arith.constant dense<0.000000e+00> : vector<16x128xf32>
    %256 = tpu.matmul %255, %155, %cst_74 {dimension_numbers = #tpu.dot_dimension_numbers<[1], [0], [0], [1], [0, 0, 1, 1], [], []>} : vector<16x32xbf16>, vector<32x128xbf16>, vector<16x128xf32> -> vector<16x128xf32>
    %257 = vector.broadcast %149 : vector<1x128xf32> to vector<16x128xf32>
    %258 = arith.addf %256, %257 : vector<16x128xf32>
    %cst_75 = arith.constant 5.000000e-01 : f32
    %259 = vector.broadcast %cst_75 : f32 to vector<16x128xf32>
    %260 = arith.mulf %259, %258 : vector<16x128xf32>
    %cst_76 = arith.constant 4.471500e-02 : f32
    %261 = vector.broadcast %cst_76 : f32 to vector<16x128xf32>
    %262 = arith.mulf %261, %258 : vector<16x128xf32>
    %263 = arith.mulf %262, %258 : vector<16x128xf32>
    %264 = arith.mulf %263, %258 : vector<16x128xf32>
    %265 = arith.addf %258, %264 : vector<16x128xf32>
    %cst_77 = arith.constant 0.797884583 : f32
    %266 = vector.broadcast %cst_77 : f32 to vector<16x128xf32>
    %267 = arith.mulf %266, %265 : vector<16x128xf32>
    %268 = math.tanh %267 : vector<16x128xf32>
    %cst_78 = arith.constant 1.000000e+00 : f32
    %269 = vector.broadcast %cst_78 : f32 to vector<16x128xf32>
    %270 = arith.addf %269, %268 : vector<16x128xf32>
    %271 = arith.mulf %260, %270 : vector<16x128xf32>
    %272 = arith.truncf %271 : vector<16x128xf32> to vector<16x128xbf16>
    %cst_79 = arith.constant dense<0.000000e+00> : vector<16x32xf32>
    %273 = tpu.matmul %272, %157, %cst_79 {dimension_numbers = #tpu.dot_dimension_numbers<[1], [0], [0], [1], [0, 0, 1, 1], [], []>} : vector<16x128xbf16>, vector<128x32xbf16>, vector<16x32xf32> -> vector<16x32xf32>
    %274 = vector.broadcast %150 : vector<1x32xf32> to vector<16x32xf32>
    %275 = arith.addf %273, %274 : vector<16x32xf32>
    %276 = arith.addf %234, %275 : vector<16x32xf32>
    %c8 = arith.constant 8 : index
    %c0_80 = arith.constant 0 : index
    %277 = vector.load %arg3[%c8, %c0_80] : memref<32x128xf32, #tpu.memory_space<vmem>>, vector<1x128xf32>
    %278 = vector.extract_strided_slice %277 {offsets = [0, 0], sizes = [1, 32], strides = [1, 1]} : vector<1x128xf32> to vector<1x32xf32>
    %279 = vector.extract_strided_slice %277 {offsets = [0, 32], sizes = [1, 32], strides = [1, 1]} : vector<1x128xf32> to vector<1x32xf32>
    %cst_81 = arith.constant dense<0.000000e+00> : vector<16xf32>
    %280 = vector.multi_reduction <add>, %276, %cst_81 [1] : vector<16x32xf32> to vector<16xf32>
    %281 = vector.shape_cast %280 : vector<16xf32> to vector<16x1xf32>
    %cst_82 = arith.constant 3.200000e+01 : f32
    %282 = vector.broadcast %cst_82 : f32 to vector<16x1xf32>
    %283 = arith.divf %281, %282 : vector<16x1xf32>
    %284 = vector.broadcast %283 : vector<16x1xf32> to vector<16x32xf32>
    %285 = arith.subf %276, %284 : vector<16x32xf32>
    %286 = arith.mulf %285, %285 : vector<16x32xf32>
    %cst_83 = arith.constant dense<0.000000e+00> : vector<16xf32>
    %287 = vector.multi_reduction <add>, %286, %cst_83 [1] : vector<16x32xf32> to vector<16xf32>
    %288 = vector.shape_cast %287 : vector<16xf32> to vector<16x1xf32>
    %cst_84 = arith.constant 3.200000e+01 : f32
    %289 = vector.broadcast %cst_84 : f32 to vector<16x1xf32>
    %290 = arith.divf %288, %289 : vector<16x1xf32>
    %cst_85 = arith.constant 9.99999974E-6 : f32
    %291 = vector.broadcast %cst_85 : f32 to vector<16x1xf32>
    %292 = arith.addf %290, %291 : vector<16x1xf32>
    %293 = math.rsqrt %292 : vector<16x1xf32>
    %294 = vector.broadcast %293 : vector<16x1xf32> to vector<16x32xf32>
    %295 = arith.mulf %285, %294 : vector<16x32xf32>
    %296 = vector.broadcast %278 : vector<1x32xf32> to vector<16x32xf32>
    %297 = arith.mulf %295, %296 : vector<16x32xf32>
    %298 = vector.broadcast %279 : vector<1x32xf32> to vector<16x32xf32>
    %299 = arith.addf %297, %298 : vector<16x32xf32>
    %300 = arith.truncf %299 : vector<16x32xf32> to vector<16x32xbf16>
    %cst_86 = arith.constant dense<0.000000e+00> : vector<16x128xf32>
    %301 = tpu.matmul %300, %1, %cst_86 {dimension_numbers = #tpu.dot_dimension_numbers<[1], [1], [0], [0], [0, 0, 1, 0], [], []>} : vector<16x32xbf16>, vector<128x32xbf16>, vector<16x128xf32> -> vector<16x128xf32>
    %c0_87 = arith.constant 0 : index
    %c0_88 = arith.constant 0 : index
    %302 = vector.load %arg4[%c0_87, %c0_88] : memref<16x128xf32, #tpu.memory_space<vmem>>, vector<16x128xf32>
    tpu.vector_store %arg4[%c0_87, %c0_88], %301 {strides = array<i32>} : memref<16x128xf32, #tpu.memory_space<vmem>>, vector<16x128xf32>,
    return
  }
}

</mosaic_0001>

<bundles_post_ra>
// kernel: tpu_custom_call.1
= control target key start
LH: loop header
LB: loop body
LE: loop exit
PB: predicated region body
PF: predicated region fallthrough
CT: control target
= control target key end

     0   :  { %v2153_v1 = vmov 0.0   ;;  %vm2154_vm0 = vmmov 0   ;;  %s2657_s0 = inlined_call_operand.vmem [shape: bf16[16,128], index: 0, kind: input, shape index: {}]   ;;  %s2658_s1 = inlined_call_operand.vmem [shape: bf16[2,32,256], index: 1, kind: input, shape index: {}]   ;;  %s2659_s2 = inlined_call_operand.vmem [shape: bf16[3,128,32], index: 2, kind: input, shape index: {}]   ;;  %s2660_s3 = inlined_call_operand.vmem [shape: f32[32,128], index: 3, kind: input, shape index: {}]   ;;  %s2661_s4 = inlined_call_operand.hbm [shape: f32[16,128], index: 4, kind: output, shape index: {}]  }
   0x1   :  { %v2024_v0 = vld [vmem:[%s2659_s2] sm:$0xff]   ;;  %1829 = vmatprep.subr.bf16.mxu0 %v2153_v1  ;;  %1863 = vmatprep.subr.bf16.mxu1 %v2153_v1  ;;  %v2025_v2 = vld [vmem:[%s2659_s2 + $0x8] sm:$0xff]   ;;  %v2026_v3 = vld [vmem:[%s2659_s2 + $0x10] sm:$0xff]  }
   0x2   :  { %1830 = vmatpush3.bf16.msra.mxu0 %v2024_v0  ;;  %1845 = vmatprep.mubr.msk.bf16.mxu0 %vm2154_vm0, %v2153_v1  ;;  %v2027_v4 = vld [vmem:[%s2659_s2 + $0x18] sm:$0xff]   ;;  %v2028_v5 = vld [vmem:[%s2659_s2 + $0x20] sm:$0xff]   ;;  %v2029_v6 = vld [vmem:[%s2659_s2 + $0x28] sm:$0xff]  }
   0x3   :  { %1831 = vmatprep.subr.bf16.mxu0 %v2153_v1  ;;  %1865 = vmatprep.mubr.msk.bf16.mxu1 %vm2154_vm0, %v2153_v1  ;;  %v2030_v7 = vld [vmem:[%s2659_s2 + $0x30] sm:$0xff]  }
   0x6   :  { %1832 = vmatpush3.bf16.msra.mxu0 %v2025_v2 }
   0x7   :  { %1833 = vmatprep.subr.bf16.mxu0 %v2153_v1 }
   0xa   :  { %1834 = vmatpush3.bf16.msra.mxu0 %v2026_v3 }
   0xb   :  { %1835 = vmatprep.subr.bf16.mxu0 %v2153_v1 }
   0xe   :  { %1836 = vmatpush3.bf16.msra.mxu0 %v2027_v4 }
   0xf   :  { %1837 = vmatprep.subr.bf16.mxu0 %v2153_v1 }
  0x12   :  { %1838 = vmatpush3.bf16.msra.mxu0 %v2028_v5 }
  0x13   :  { %1839 = vmatprep.subr.bf16.mxu0 %v2153_v1 }
  0x16   :  { %1840 = vmatpush3.bf16.msra.mxu0 %v2029_v6 }
  0x17   :  { %9 = vsyncpa [#allocation3], 0  ;;  %1841 = vmatprep.subr.bf16.mxu0 %v2153_v1  ;;  %v2031_v8 = vld [vmem:[%s2659_s2 + $0x38] sm:$0xff]   ;;  %v2032_v9 = vld [vmem:[%s2657_s0] sm:$0xff]   ;;  %vm159_vm1 = vcmask 261120   ;;  %s2155_s8 = smov 96  }
  0x18   :  { %v2243_v16 = vld [vmem:[%s2660_s3] ss:$0 sm:$0xff]  ;;  %v2261_v28 = vld [vmem:[%s2658_s1 + $0x10] ss:$8 sps:$4 sm:$0xff]   ;;  %v2273_v45 = vld [vmem:[%s2660_s3 + $0x1] ss:$0 sm:$0xff] }
  0x19   :  { %v2254_v27 = vld [vmem:[%s2658_s1] ss:$8 sps:$4 sm:$0xff]   ;;  %s2156_s15 = smov 80   ;;  %s2157_s16 = smov 112   ;;  %vm264_vm2 = vcmask 130048   ;;  %v2299_v58 = vld [vmem:[%s2660_s3 + $0x10] sm:$0xff] }
  0x1a   :  { %1842 = vmatpush3.bf16.msra.mxu0 %v2030_v7  ;;  %v2304_v60 = vld [vmem:[%s2660_s3 + $0x18] sm:$0xff]  ;;  %s2158_s21 = smov 64   ;;  %s2159_s22 = smov 48  }
  0x1b   :  { %1843 = vmatprep.subr.bf16.mxu0 %v2153_v1  ;;  %s2160_s23 = smov 32  }
  0x1e   :  { %1844 = vmatpush3.bf16.msra.mxu0 %v2031_v8 }
  0x1f   :  { %1849 = vmatprep.subr.bf16.mxu0 %v2153_v1 }
  0x21   :  { %1846 = vmatmul.mubr.bf16.vlgmr.msra.gmra.mrb[0].mxu0 %v2032_v9 }
  0x22   :  { %1853 = vmatprep.mubr.msk.bf16.mxu0 %vm2154_vm0, %v2153_v1  ;;  %1850 = vmatpush3.bf16.msra.mxu0 %v2254_v27 }
  0x23   :  { %1851 = vmatprep.subr.bf16.mxu0 %v2153_v1 }
  0x26   :  { %1852 = vmatpush3.bf16.msra.mxu0 %v2261_v28 }
  0x27   :  { %1857 = vmatprep.subr.bf16.mxu0 %v2153_v1 }
  0xf4   :  { %v2232_v10 = vpop.f32.mrb[0].mxu0 }
  0xf5   :  { %v1847_v11 = vpop.f32.mrb[1].mxu0  ;;  %v160_v12 = vsel %vm159_vm1, %v2232_v10, 0.0 }
  0xf6   :  { %161 = vadd.xlane.f32.xlu0 %v160_v12  ;;  %v2236_v13 = vpop.f32.mrb[2].mxu0 }
  0xf7   :  { %v1848_v14 = vpop.f32.mrb[3].mxu0  ;;  %v163_v15 = vsel %vm159_vm1, %v2236_v13, 0.0 }
  0xfa   :  { %164 = vadd.xlane.f32.xlu0 %v163_v15 }
 0x110   :  { %194 = vrot.lane.b32.xlu0 %v2243_v16, %s2155_s8 }
 0x183   :  { %v162_v17 = vpop.xlane.xlu0 %161 }
 0x184   :  { %v167_v18 = vmul.f32 0.03125, %v162_v17 }
 0x186   :  { %v169_v19 = vsub.f32 %v2232_v10, %v167_v18 }
 0x187   :  { %v165_v20 = vpop.xlane.xlu0 %164 }
 0x188   :  { %v168_v21 = vmul.f32 0.03125, %v165_v20  ;;  %v171_v22 = vmul.f32 %v169_v19, %v169_v19 }
 0x18a   :  { %v170_v23 = vsub.f32 %v2236_v13, %v168_v21  ;;  %v173_v24 = vsel %vm159_vm1, %v171_v22, 0.0 }
 0x18b   :  { %174 = vadd.xlane.f32.xlu1 %v173_v24  ;;  %v195_v40 = vpop.permute.xlu0 %194 }
 0x18c   :  { %v172_v25 = vmul.f32 %v170_v23, %v170_v23 }
 0x18e   :  { %v176_v26 = vsel %vm159_vm1, %v172_v25, 0.0 }
 0x18f   :  { %177 = vadd.xlane.f32.xlu1 %v176_v26 }
 0x218   :  { %v175_v29 = vpop.xlane.xlu1 %174 }
 0x219   :  { %v179_v30 = vmul.f32 0.03125, %v175_v29 }
 0x21b   :  { %v181_v31 = vadd.f32 1e-05, %v179_v30 }
 0x21c   :  { %v178_v32 = vpop.xlane.xlu1 %177 }
 0x21d   :  { %2061 = vrsqrt.f32 %v181_v31  ;;  %v180_v33 = vmul.f32 0.03125, %v178_v32 }
 0x21f   :  { %v182_v34 = vadd.f32 1e-05, %v180_v33 }
 0x221   :  { %2063 = vrsqrt.f32 %v182_v34 }
 0x227   :  { %v2062_v35 = vpop.eup %2061 }
 0x228   :  { %v185_v36 = vmul.f32 %v2062_v35, %v169_v19 }
 0x22a   :  { %v191_v39 = vmul.f32 %v2243_v16, %v185_v36 }
 0x22b   :  { %v2064_v37 = vpop.eup %2063 }
 0x22c   :  { %v186_v38 = vmul.f32 %v2064_v37, %v170_v23  ;;  %v197_v42 = vadd.f32 %v195_v40, %v191_v39 }
 0x22e   :  { %v192_v41 = vmul.f32 %v2243_v16, %v186_v38 }
 0x230   :  { %v198_v43 = vadd.f32 %v195_v40, %v192_v41 }
 0x232   :  { %v199_v44 = vpack.c.bf16 %v198_v43, %v197_v42 }
 0x234   :  { %1854 = vmatmul.mubr.msk.bf16.vlgmr.msra.gmra.mrb[4].mxu0 %vm159_vm1, %v199_v44 }
 0x235   :  { %1859 = vmatprep.mubr.msk.bf16.mxu0 %vm2154_vm0, %v2153_v1 }
 0x307   :  { %v253_v46 = vpop.f32.mrb[4].mxu0 }
 0x308   :  { %v1855_v47 = vpop.f32.mrb[5].mxu0  ;;  %v254_v49 = vadd.f32 %v2273_v45, %v253_v46 }
 0x309   :  { %v256_v48 = vpop.f32.mrb[6].mxu0 }
 0x30a   :  { %v257_v50 = vadd.f32 %v2273_v45, %v256_v48  ;;  %v1856_v51 = vpop.f32.mrb[7].mxu0 }
 0x30c   :  { %v2277_v52 = vpack.c.bf16 %v257_v50, %v254_v49 }
 0x30e   :  { %262 = vrot.lane.b32.xlu1 %v2277_v52, %s2155_s8 }
 0x312   :  { %442 = vrot.lane.b32.xlu1 %v2277_v52, %s2156_s15 }
 0x316   :  { %440 = vrot.lane.b32.xlu1 %v2277_v52, %s2157_s16 }
 0x380   :  { %v263_v53 = vpop.permute.xlu1 %262 }
 0x381   :  { %v269_v54 = vsel %vm264_vm2, %v263_v53, 0 }
 0x382   :  { %1858 = vmatpush3.bf16.xpose.msra.mxu0 %v269_v54 }
 0x383   :  { %1875 = vmatprep.subr.bf16.mxu0 %v2153_v1 }
 0x384   :  { %v443_v55 = vpop.permute.xlu1 %442 }
 0x385   :  { %v448_v56 = vsel %vm264_vm2, %v443_v55, 0 }
 0x388   :  { %v441_v57 = vpop.permute.xlu1 %440 }
 0x389   :  { %1860 = vmatmul.mubr.msk.bf16.vlgmr.msra.gmra.mrb[8].mxu0 %vm264_vm2, %v2277_v52 }
 0x38a   :  { %1876 = vmatpush3.bf16.xpose.msra.mxu0 %v448_v56  ;;  %1877 = vmatprep.mubr.msk.bf16.mxu0 %vm2154_vm0, %v2153_v1 }
 0x38b   :  { %1887 = vmatprep.subr.bf16.mxu0 %v2153_v1 }
 0x391   :  { %1878 = vmatmul.mubr.msk.bf16.vlgmr.msra.gmra.mrb[12].mxu0 %vm264_vm2, %v441_v57 }
 0x392   :  { %1889 = vmatprep.mubr.msk.bf16.mxu0 %vm2154_vm0, %v2153_v1 }
 0x45c   :  { %v305_v59 = vpop.f32.mrb[8].mxu0 }
 0x45d   :  { %v306_v61 = vadd.f32 %v305_v59, %v2299_v58  ;;  %v1861_v62 = vpop.f32.mrb[9].mxu0 }
 0x45e   :  { %v308_v63 = vpop.f32.mrb[10].mxu0 }
 0x45f   :  { %v309_v0 = vadd.f32 %v308_v63, %v2304_v60  ;;  %v1862_v2 = vpop.f32.mrb[11].mxu0  ;;  %v312_v3 = vsel %vm264_vm2, %v306_v61, -inf }
 0x460   :  { %313 = vmax.xlane.f32.xlu0 %v312_v3 }
 0x461   :  { %v315_v4 = vsel %vm264_vm2, %v309_v0, -inf }
 0x462   :  { %316 = vmax.xlane.f32.xlu1 %v315_v4 }
 0x464   :  { %v484_v5 = vpop.f32.mrb[12].mxu0 }
 0x465   :  { %v485_v6 = vadd.f32 %v484_v5, %v2299_v58  ;;  %v1879_v7 = vpop.f32.mrb[13].mxu0 }
 0x466   :  { %v487_v8 = vpop.f32.mrb[14].mxu0 }
 0x467   :  { %v488_v9 = vadd.f32 %v487_v8, %v2304_v60  ;;  %v1880_v11 = vpop.f32.mrb[15].mxu0  ;;  %v491_v12 = vsel %vm264_vm2, %v485_v6, -inf }
 0x468   :  { %492 = vmax.xlane.f32.xlu1 %v491_v12 }
 0x469   :  { %v494_v14 = vsel %vm264_vm2, %v488_v9, -inf }
 0x46c   :  { %495 = vmax.xlane.f32.xlu1 %v494_v14 }
 0x4ed   :  { %v314_v15 = vpop.xlane.xlu0 %313 }
 0x4ee   :  { %v318_v17 = vsub.f32 %v306_v61, %v314_v15 }
 0x4ef   :  { %v317_v18 = vpop.xlane.xlu1 %316 }
 0x4f0   :  { %v320_v19 = vmul.f32 1.442695, %v318_v17  ;;  %v319_v20 = vsub.f32 %v309_v0, %v317_v18 }
 0x4f2   :  { %2065 = vpow2.f32 %v320_v19  ;;  %v322_v21 = vmul.f32 1.442695, %v319_v20 }
 0x4f4   :  { %2067 = vpow2.f32 %v322_v21 }
 0x4f5   :  { %v493_v22 = vpop.xlane.xlu1 %492 }
 0x4f6   :  { %v497_v23 = vsub.f32 %v485_v6, %v493_v22 }
 0x4f8   :  { %v499_v24 = vmul.f32 1.442695, %v497_v23 }
 0x4f9   :  { %v496_v25 = vpop.xlane.xlu1 %495 }
 0x4fa   :  { %2069 = vpow2.f32 %v499_v24  ;;  %v498_v26 = vsub.f32 %v488_v9, %v496_v25 }
 0x4fc   :  { %v2066_v29 = vpop.eup %2065  ;;  %v501_v30 = vmul.f32 1.442695, %v498_v26 }
 0x4fd   :  { %v324_v31 = vsel %vm264_vm2, %v2066_v29, 0.0 }
 0x4fe   :  { %v2068_v32 = vpop.eup %2067  ;;  %2071 = vpow2.f32 %v501_v30  ;;  %325 = vadd.xlane.f32.xlu0 %v324_v31 }
 0x4ff   :  { %v327_v33 = vsel %vm264_vm2, %v2068_v32, 0.0 }
 0x502   :  { %328 = vadd.xlane.f32.xlu0 %v327_v33 }
 0x504   :  { %v2070_v34 = vpop.eup %2069 }
 0x505   :  { %v503_v35 = vsel %vm264_vm2, %v2070_v34, 0.0 }
 0x506   :  { %504 = vadd.xlane.f32.xlu1 %v503_v35 }
 0x508   :  { %v2072_v36 = vpop.eup %2071 }
 0x509   :  { %v506_v37 = vsel %vm264_vm2, %v2072_v36, 0.0 }
 0x50a   :  { %507 = vadd.xlane.f32.xlu1 %v506_v37 }
 0x518   :  { %335 = vrot.lane.b32.xlu0 %v2277_v52, %s2158_s21 }
 0x51b   :  { %383 = vrot.lane.b32.xlu1 %v2254_v27, %s2160_s23 }
 0x51c   :  { %514 = vrot.lane.b32.xlu0 %v2277_v52, %s2159_s22 }
 0x520   :  { %562 = vrot.lane.b32.xlu0 %v2261_v28, %s2160_s23 }
 0x58b   :  { %v326_v38 = vpop.xlane.xlu0 %325 }
 0x58c   :  { %2073 = vrcp.f32 %v326_v38  ;;  %v2037_v38 = vld [vmem:[%s2658_s1 + $0x4] ss:$8 sps:$4 sm:$0xff]  }
 0x58f   :  { %v329_v39 = vpop.xlane.xlu0 %328 }
 0x590   :  { %2075 = vrcp.f32 %v329_v39  ;;  %v2038_v39 = vld [vmem:[%s2658_s1 + $0x14] ss:$8 sps:$4 sm:$0xff]  }
 0x593   :  { %v336_v40 = vpop.permute.xlu0 %335  ;;  %v505_v41 = vpop.xlane.xlu1 %504 }
 0x594   :  { %1864 = vmatpush3.bf16.msra.mxu1 %v336_v40  ;;  %2077 = vrcp.f32 %v505_v41 }
 0x595   :  { %1869 = vmatprep.subr.bf16.mxu1 %v2153_v1 }
 0x596   :  { %v2074_v43 = vpop.eup %2073 }
 0x597   :  { %v508_v42 = vpop.xlane.xlu1 %507  ;;  %v332_v46 = vmul.f32 %v2074_v43, %v2066_v29  ;;  %v515_v59 = vpop.permute.xlu0 %514 }
 0x598   :  { %2079 = vrcp.f32 %v508_v42 }
 0x59a   :  { %v2076_v44 = vpop.eup %2075 }
 0x59b   :  { %v333_v47 = vmul.f32 %v2076_v44, %v2068_v32  ;;  %v384_v48 = vpop.permute.xlu1 %383  ;;  %v563_v61 = vpop.permute.xlu0 %562 }
 0x59c   :  { %1888 = vmatpush3.bf16.msra.mxu0 %v563_v61  ;;  %v2043_v61 = vld [vmem:[%s2659_s2 + $0x60] sm:$0xff]  }
 0x59d   :  { %v334_v27 = vpack.c.bf16 %v333_v47, %v332_v46  ;;  %1901 = vmatprep.subr.bf16.mxu0 %v2153_v1 }
 0x59e   :  { %v2078_v28 = vpop.eup %2077 }
 0x59f   :  { %1866 = vmatmul.mubr.msk.bf16.vlgmr.msra.gmra.mrb[0].mxu1 %vm264_vm2, %v334_v27  ;;  %v511_v50 = vmul.f32 %v2078_v28, %v2070_v34 }
 0x5a0   :  { %1870 = vmatpush3.bf16.msra.mxu1 %v384_v48  ;;  %1871 = vmatprep.mubr.msk.bf16.mxu1 %vm2154_vm0, %v2153_v1 }
 0x5a1   :  { %1881 = vmatprep.subr.bf16.mxu1 %v2153_v1 }
 0x5a2   :  { %v2080_v49 = vpop.eup %2079 }
 0x5a3   :  { %v512_v51 = vmul.f32 %v2080_v49, %v2072_v36 }
 0x5a5   :  { %v513_v52 = vpack.c.bf16 %v512_v51, %v511_v50 }
 0x672   :  { %v375_v53 = vpop.f32.mrb[0].mxu1 }
 0x673   :  { %v1867_v54 = vpop.f32.mrb[1].mxu1 }
 0x674   :  { %v378_v55 = vpop.f32.mrb[2].mxu1 }
 0x675   :  { %v382_v56 = vpack.c.bf16 %v378_v55, %v375_v53  ;;  %v1868_v57 = vpop.f32.mrb[3].mxu1  ;;  %v2039_v55 = vld [vmem:[%s2659_s2 + $0x40] sm:$0xff]  }
 0x676   :  { %v2041_v57 = vld [vmem:[%s2659_s2 + $0x50] sm:$0xff]  }
 0x677   :  { %1872 = vmatmul.mubr.msk.bf16.vlgmr.msra.gmra.mrb[4].mxu1 %vm264_vm2, %v382_v56  ;;  %v2040_v56 = vld [vmem:[%s2659_s2 + $0x48] sm:$0xff]  }
 0x678   :  { %1882 = vmatpush3.bf16.msra.mxu1 %v515_v59  ;;  %1883 = vmatprep.mubr.msk.bf16.mxu1 %vm2154_vm0, %v2153_v1  ;;  %v2042_v59 = vld [vmem:[%s2659_s2 + $0x58] sm:$0xff]  }
 0x679   :  { %1893 = vmatprep.subr.bf16.mxu1 %v2153_v1 }
 0x67f   :  { %1884 = vmatmul.mubr.msk.bf16.vlgmr.msra.gmra.mrb[8].mxu1 %vm264_vm2, %v513_v52 }
 0x680   :  { %1897 = vmatprep.mubr.msk.bf16.mxu1 %vm2154_vm0, %v2153_v1  ;;  %1894 = vmatpush3.bf16.msra.mxu1 %v2037_v38 }
 0x681   :  { %1895 = vmatprep.subr.bf16.mxu1 %v2153_v1 }
 0x684   :  { %1896 = vmatpush3.bf16.msra.mxu1 %v2038_v39 }
 0x685   :  { %1921 = vmatprep.subr.bf16.mxu1 %v2153_v1 }
 0x74a   :  { %v423_v62 = vpop.f32.mrb[4].mxu1 }
 0x74b   :  { %432 = vrot.lane.b32.xlu0 %v423_v62, %s2155_s8  ;;  %v1873_v63 = vpop.f32.mrb[5].mxu1  ;;  %v2044_v62 = vld [vmem:[%s2659_s2 + $0x68] sm:$0xff]  }
 0x74c   :  { %v426_v0 = vpop.f32.mrb[6].mxu1  ;;  %v2045_v63 = vld [vmem:[%s2659_s2 + $0x70] sm:$0xff]  }
 0x74d   :  { %434 = vrot.lane.b32.xlu1 %v426_v0, %s2155_s8  ;;  %v1874_v2 = vpop.f32.mrb[7].mxu1  ;;  %v2046_v0 = vld [vmem:[%s2659_s2 + $0x78] sm:$0xff]  }
 0x74e   :  { %v1698_v2 = vld [vmem:[%s2660_s3 + $0x2] ss:$0 sm:$0xff] }
 0x752   :  { %v554_v3 = vpop.f32.mrb[8].mxu1 }
 0x753   :  { %v1885_v4 = vpop.f32.mrb[9].mxu1 }
 0x754   :  { %v557_v5 = vpop.f32.mrb[10].mxu1 }
 0x755   :  { %v561_v6 = vpack.c.bf16 %v557_v5, %v554_v3  ;;  %v1886_v7 = vpop.f32.mrb[11].mxu1 }
 0x757   :  { %1890 = vmatmul.mubr.msk.bf16.vlgmr.msra.gmra.mrb[16].mxu0 %vm264_vm2, %v561_v6 }
 0x758   :  { %1917 = vmatprep.mubr.msk.bf16.mxu0 %vm2154_vm0, %v2153_v1  ;;  %1902 = vmatpush3.bf16.msra.mxu0 %v2039_v55 }
 0x759   :  { %1903 = vmatprep.subr.bf16.mxu0 %v2153_v1 }
 0x75c   :  { %1904 = vmatpush3.bf16.msra.mxu0 %v2040_v56 }
 0x75d   :  { %1905 = vmatprep.subr.bf16.mxu0 %v2153_v1 }
 0x760   :  { %1906 = vmatpush3.bf16.msra.mxu0 %v2041_v57 }
 0x761   :  { %1907 = vmatprep.subr.bf16.mxu0 %v2153_v1 }
 0x764   :  { %1908 = vmatpush3.bf16.msra.mxu0 %v2042_v59 }
 0x765   :  { %1909 = vmatprep.subr.bf16.mxu0 %v2153_v1 }
 0x768   :  { %1910 = vmatpush3.bf16.msra.mxu0 %v2043_v61 }
 0x769   :  { %1911 = vmatprep.subr.bf16.mxu0 %v2153_v1 }
 0x76c   :  { %1912 = vmatpush3.bf16.msra.mxu0 %v2044_v62 }
 0x76d   :  { %1913 = vmatprep.subr.bf16.mxu0 %v2153_v1 }
 0x770   :  { %1914 = vmatpush3.bf16.msra.mxu0 %v2045_v63 }
 0x771   :  { %1915 = vmatprep.subr.bf16.mxu0 %v2153_v1 }
 0x774   :  { %1916 = vmatpush3.bf16.msra.mxu0 %v2046_v0 }
 0x775   :  { %1947 = vmatprep.subr.bf16.mxu0 %v2153_v1 }
 0x7bd   :  { %v433_v14 = vpop.permute.xlu0 %432 }
 0x7be   :  { %v438_v17 = vadd.f32 %v2273_v45, %v433_v14 }
 0x7bf   :  { %v435_v15 = vpop.permute.xlu1 %434 }
 0x7c0   :  { %v439_v19 = vadd.f32 %v2273_v45, %v435_v15 }
 0x82a   :  { %v602_v8 = vpop.f32.mrb[16].mxu0 }
 0x82b   :  { %611 = vrot.lane.b32.xlu0 %v602_v8, %s2155_s8  ;;  %v1891_v9 = vpop.f32.mrb[17].mxu0 }
 0x82c   :  { %v605_v11 = vpop.f32.mrb[18].mxu0 }
 0x82d   :  { %613 = vrot.lane.b32.xlu1 %v605_v11, %s2155_s8  ;;  %v1892_v12 = vpop.f32.mrb[19].mxu0 }
 0x89d   :  { %v612_v18 = vpop.permute.xlu0 %611 }
 0x89e   :  { %v617_v20 = vadd.f32 %v612_v18, %v438_v17 }
 0x89f   :  { %v614_v21 = vpop.permute.xlu1 %613 }
 0x8a0   :  { %v618_v22 = vadd.f32 %v614_v21, %v439_v19  ;;  %621 = vrot.lane.b32.xlu0 %v617_v20, %s2160_s23 }
 0x8a2   :  { %623 = vrot.lane.b32.xlu1 %v618_v22, %s2160_s23 }
 0x912   :  { %v622_v23 = vpop.permute.xlu0 %621 }
 0x913   :  { %v2351_v24 = vadd.f32 %v622_v23, %v2232_v10 }
 0x914   :  { %v624_v25 = vpop.permute.xlu1 %623 }
 0x915   :  { %v2354_v26 = vadd.f32 %v624_v25, %v2236_v13  ;;  %v629_v29 = vsel %vm159_vm1, %v2351_v24, 0.0 }
 0x916   :  { %630 = vadd.xlane.f32.xlu0 %v629_v29 }
 0x917   :  { %v632_v45 = vsel %vm159_vm1, %v2354_v26, 0.0 }
 0x918   :  { %633 = vadd.xlane.f32.xlu1 %v632_v45 }
 0x929   :  { %660 = vrot.lane.b32.xlu1 %v2243_v16, %s2160_s23 }
 0x9a3   :  { %v631_v30 = vpop.xlane.xlu0 %630 }
 0x9a4   :  { %v635_v31 = vmul.f32 0.03125, %v631_v30 }
 0x9a5   :  { %v634_v32 = vpop.xlane.xlu1 %633 }
 0x9a6   :  { %v637_v10 = vsub.f32 %v2351_v24, %v635_v31  ;;  %v636_v33 = vmul.f32 0.03125, %v634_v32 }
 0x9a8   :  { %v638_v13 = vsub.f32 %v2354_v26, %v636_v33  ;;  %v639_v34 = vmul.f32 %v637_v10, %v637_v10  ;;  %v1702_v33 = vld [vmem:[%s2660_s3 + $0x3] ss:$0 sm:$0xff] }
 0x9a9   :  { %v661_v50 = vpop.permute.xlu1 %660 }
 0x9aa   :  { %v641_v35 = vsel %vm159_vm1, %v639_v34, 0.0  ;;  %v640_v36 = vmul.f32 %v638_v13, %v638_v13 }
 0x9ab   :  { %642 = vadd.xlane.f32.xlu0 %v641_v35 }
 0x9ac   :  { %v644_v37 = vsel %vm159_vm1, %v640_v36, 0.0 }
 0x9af   :  { %645 = vadd.xlane.f32.xlu0 %v644_v37 }
 0x9c5   :  { %655 = vrot.lane.b32.xlu0 %v2243_v16, %s2158_s21 }
 0xa38   :  { %v643_v40 = vpop.xlane.xlu0 %642 }
 0xa39   :  { %v647_v41 = vmul.f32 0.03125, %v643_v40 }
 0xa3b   :  { %v649_v42 = vadd.f32 1e-05, %v647_v41 }
 0xa3c   :  { %v646_v43 = vpop.xlane.xlu0 %645 }
 0xa3d   :  { %2081 = vrsqrt.f32 %v649_v42  ;;  %v648_v16 = vmul.f32 0.03125, %v646_v43 }
 0xa3f   :  { %v650_v44 = vadd.f32 1e-05, %v648_v16 }
 0xa40   :  { %v656_v27 = vpop.permute.xlu0 %655 }
 0xa41   :  { %2083 = vrsqrt.f32 %v650_v44 }
 0xa47   :  { %v2082_v46 = vpop.eup %2081 }
 0xa48   :  { %v653_v47 = vmul.f32 %v2082_v46, %v637_v10 }
 0xa4a   :  { %v658_v49 = vmul.f32 %v656_v27, %v653_v47 }
 0xa4b   :  { %v2084_v48 = vpop.eup %2083 }
 0xa4c   :  { %v654_v28 = vmul.f32 %v2084_v48, %v638_v13  ;;  %v663_v52 = vadd.f32 %v661_v50, %v658_v49  ;;  %v2436_v49 = vld [vmem:[%s2660_s3 + $0x4] ss:$0 sm:$0xff] }
 0xa4e   :  { %v659_v51 = vmul.f32 %v656_v27, %v654_v28 }
 0xa50   :  { %v664_v53 = vadd.f32 %v661_v50, %v659_v51  ;;  %v2441_v50 = vld [vmem:[%s2658_s1 + $0x20] ss:$8 sps:$4 sm:$0xff]   ;;  %v2450_v51 = vld [vmem:[%s2658_s1 + $0x30] ss:$8 sps:$4 sm:$0xff]  }
 0xa52   :  { %v665_v54 = vpack.c.bf16 %v664_v53, %v663_v52 }
 0xa54   :  { %1898 = vmatmul.mubr.msk.bf16.vlgmr.msra.gmra.mrb[12].mxu1 %vm159_vm1, %v665_v54 }
 0xa55   :  { %1925 = vmatprep.mubr.msk.bf16.mxu1 %vm2154_vm0, %v2153_v1  ;;  %1922 = vmatpush3.bf16.msra.mxu1 %v2441_v50 }
 0xa56   :  { %1923 = vmatprep.subr.bf16.mxu1 %v2153_v1 }
 0xa59   :  { %1924 = vmatpush3.bf16.msra.mxu1 %v2450_v51 }
 0xa5a   :  { %1929 = vmatprep.subr.bf16.mxu1 %v2153_v1 }
 0xb27   :  { %v715_v3 = vpop.f32.mrb[12].mxu1 }
 0xb28   :  { %v716_v4 = vadd.f32 %v1698_v2, %v715_v3  ;;  %v1899_v5 = vpop.f32.mrb[13].mxu1 }
 0xb29   :  { %v718_v6 = vpop.f32.mrb[14].mxu1 }
 0xb2a   :  { %v724_v7 = vmul.f32 0.044715, %v716_v4  ;;  %v719_v8 = vadd.f32 %v1698_v2, %v718_v6  ;;  %v1900_v9 = vpop.f32.mrb[15].mxu1  ;;  %v722_v29 = vmul.f32 0.5, %v716_v4 }
 0xb2c   :  { %v726_v11 = vmul.f32 %v724_v7, %v716_v4  ;;  %v725_v12 = vmul.f32 0.044715, %v719_v8  ;;  %v723_v45 = vmul.f32 0.5, %v719_v8  ;;  %v2462_v7 = vld [vmem:[%s2660_s3 + $0x5] ss:$0 sm:$0xff] }
 0xb2e   :  { %v728_v14 = vmul.f32 %v726_v11, %v716_v4  ;;  %v727_v15 = vmul.f32 %v725_v12, %v719_v8 }
 0xb30   :  { %v730_v17 = vadd.f32 %v728_v14, %v716_v4  ;;  %v729_v18 = vmul.f32 %v727_v15, %v719_v8 }
 0xb32   :  { %v732_v19 = vmul.f32 0.7978846, %v730_v17  ;;  %v731_v20 = vadd.f32 %v729_v18, %v719_v8 }
 0xb34   :  { %2085 = vtanh.f32 %v732_v19  ;;  %v733_v21 = vmul.f32 0.7978846, %v731_v20 }
 0xb36   :  { %2087 = vtanh.f32 %v733_v21 }
 0xb3e   :  { %v2086_v22 = vpop.eup %2085 }
 0xb3f   :  { %v736_v23 = vadd.f32 1.0, %v2086_v22 }
 0xb40   :  { %v2088_v25 = vpop.eup %2087 }
 0xb41   :  { %v737_v30 = vadd.f32 1.0, %v2088_v25  ;;  %v738_v31 = vmul.f32 %v736_v23, %v722_v29 }
 0xb43   :  { %v739_v32 = vmul.f32 %v737_v30, %v723_v45 }
 0xb45   :  { %v740_v10 = vpack.c.bf16 %v739_v32, %v738_v31 }
 0xb47   :  { %1918 = vmatmul.mubr.bf16.vlgmr.msra.gmra.mrb[20].mxu0 %v740_v10 }
 0xb48   :  { %1949 = vmatprep.mubr.msk.bf16.mxu0 %vm2154_vm0, %v2153_v1 }
 0xc1a   :  { %v827_v13 = vpop.f32.mrb[20].mxu0 }
 0xc1b   :  { %v828_v34 = vadd.f32 %v1702_v33, %v827_v13  ;;  %v1919_v35 = vpop.f32.mrb[21].mxu0 }
 0xc1c   :  { %v830_v36 = vpop.f32.mrb[22].mxu0 }
 0xc1d   :  { %v2420_v37 = vadd.f32 %v828_v34, %v2351_v24  ;;  %v831_v38 = vadd.f32 %v1702_v33, %v830_v36  ;;  %v1920_v39 = vpop.f32.mrb[23].mxu0 }
 0xc1f   :  { %v2423_v40 = vadd.f32 %v831_v38, %v2354_v26  ;;  %v862_v41 = vsel %vm159_vm1, %v2420_v37, 0.0 }
 0xc20   :  { %863 = vadd.xlane.f32.xlu1 %v862_v41 }
 0xc21   :  { %v865_v42 = vsel %vm159_vm1, %v2423_v40, 0.0 }
 0xc22   :  { %866 = vadd.xlane.f32.xlu0 %v865_v42 }
 0xcad   :  { %v864_v43 = vpop.xlane.xlu1 %863 }
 0xcae   :  { %v868_v16 = vmul.f32 0.03125, %v864_v43 }
 0xcaf   :  { %v867_v44 = vpop.xlane.xlu0 %866 }
 0xcb0   :  { %v870_v46 = vsub.f32 %v2420_v37, %v868_v16  ;;  %v869_v24 = vmul.f32 0.03125, %v867_v44 }
 0xcb2   :  { %v871_v47 = vsub.f32 %v2423_v40, %v869_v24  ;;  %v872_v27 = vmul.f32 %v870_v46, %v870_v46 }
 0xcb4   :  { %v874_v26 = vsel %vm159_vm1, %v872_v27, 0.0  ;;  %v873_v48 = vmul.f32 %v871_v47, %v871_v47 }
 0xcb5   :  { %875 = vadd.xlane.f32.xlu0 %v874_v26 }
 0xcb6   :  { %v877_v28 = vsel %vm159_vm1, %v873_v48, 0.0 }
 0xcb7   :  { %878 = vadd.xlane.f32.xlu1 %v877_v28 }
 0xccb   :  { %895 = vrot.lane.b32.xlu0 %v2436_v49, %s2155_s8 }
 0xd42   :  { %v876_v52 = vpop.xlane.xlu0 %875 }
 0xd43   :  { %v880_v53 = vmul.f32 0.03125, %v876_v52 }
 0xd44   :  { %v879_v54 = vpop.xlane.xlu1 %878 }
 0xd45   :  { %v882_v55 = vadd.f32 1e-05, %v880_v53  ;;  %v881_v56 = vmul.f32 0.03125, %v879_v54 }
 0xd46   :  { %v896_v2 = vpop.permute.xlu0 %895 }
 0xd47   :  { %2089 = vrsqrt.f32 %v882_v55  ;;  %v883_v57 = vadd.f32 1e-05, %v881_v56 }
 0xd49   :  { %2091 = vrsqrt.f32 %v883_v57 }
 0xd51   :  { %v2090_v59 = vpop.eup %2089 }
 0xd52   :  { %v886_v61 = vmul.f32 %v2090_v59, %v870_v46 }
 0xd53   :  { %v2092_v62 = vpop.eup %2091 }
 0xd54   :  { %v887_v63 = vmul.f32 %v2092_v62, %v871_v47  ;;  %v892_v0 = vmul.f32 %v2436_v49, %v886_v61 }
 0xd56   :  { %v893_v3 = vmul.f32 %v2436_v49, %v887_v63  ;;  %v898_v4 = vadd.f32 %v896_v2, %v892_v0 }
 0xd58   :  { %v899_v5 = vadd.f32 %v896_v2, %v893_v3 }
 0xd5a   :  { %v900_v6 = vpack.c.bf16 %v899_v5, %v898_v4 }
 0xd5c   :  { %1926 = vmatmul.mubr.msk.bf16.vlgmr.msra.gmra.mrb[16].mxu1 %vm159_vm1, %v900_v6 }
 0xd5d   :  { %1931 = vmatprep.mubr.msk.bf16.mxu1 %vm2154_vm0, %v2153_v1 }
 0xe2f   :  { %v954_v8 = vpop.f32.mrb[16].mxu1 }
 0xe30   :  { %v1927_v9 = vpop.f32.mrb[17].mxu1  ;;  %v955_v12 = vadd.f32 %v2462_v7, %v954_v8 }
 0xe31   :  { %v957_v11 = vpop.f32.mrb[18].mxu1 }
 0xe32   :  { %v958_v14 = vadd.f32 %v2462_v7, %v957_v11  ;;  %v1928_v15 = vpop.f32.mrb[19].mxu1 }
 0xe34   :  { %v2466_v17 = vpack.c.bf16 %v958_v14, %v955_v12 }
 0xe36   :  { %963 = vrot.lane.b32.xlu1 %v2466_v17, %s2155_s8 }
 0xe3a   :  { %1142 = vrot.lane.b32.xlu1 %v2466_v17, %s2156_s15 }
 0xe3e   :  { %1140 = vrot.lane.b32.xlu1 %v2466_v17, %s2157_s16 }
 0xea8   :  { %v964_v18 = vpop.permute.xlu1 %963 }
 0xea9   :  { %v969_v19 = vsel %vm264_vm2, %v964_v18, 0 }
 0xeaa   :  { %1930 = vmatpush3.bf16.xpose.msra.mxu1 %v969_v19 }
 0xeab   :  { %1935 = vmatprep.subr.bf16.mxu1 %v2153_v1 }
 0xeac   :  { %v1143_v20 = vpop.permute.xlu1 %1142 }
 0xead   :  { %v1148_v21 = vsel %vm264_vm2, %v1143_v20, 0 }
 0xeae   :  { %1948 = vmatpush3.bf16.xpose.msra.mxu0 %v1148_v21 }
 0xeaf   :  { %1959 = vmatprep.subr.bf16.mxu0 %v2153_v1 }
 0xeb0   :  { %v1141_v22 = vpop.permute.xlu1 %1140 }
 0xeb1   :  { %1932 = vmatmul.mubr.msk.bf16.vlgmr.msra.gmra.mrb[20].mxu1 %vm264_vm2, %v2466_v17 }
 0xeb2   :  { %1937 = vmatprep.mubr.msk.bf16.mxu1 %vm2154_vm0, %v2153_v1 }
 0xeb5   :  { %1950 = vmatmul.mubr.msk.bf16.vlgmr.msra.gmra.mrb[24].mxu0 %vm264_vm2, %v1141_v22 }
 0xeb6   :  { %1961 = vmatprep.mubr.msk.bf16.mxu0 %vm2154_vm0, %v2153_v1 }
 0xf84   :  { %v1005_v23 = vpop.f32.mrb[20].mxu1 }
 0xf85   :  { %v1006_v25 = vadd.f32 %v1005_v23, %v2299_v58  ;;  %v1933_v29 = vpop.f32.mrb[21].mxu1 }
 0xf86   :  { %v1008_v45 = vpop.f32.mrb[22].mxu1 }
 0xf87   :  { %v1009_v30 = vadd.f32 %v1008_v45, %v2304_v60  ;;  %v1934_v31 = vpop.f32.mrb[23].mxu1  ;;  %v1012_v32 = vsel %vm264_vm2, %v1006_v25, -inf }
 0xf88   :  { %1013 = vmax.xlane.f32.xlu0 %v1012_v32  ;;  %v1184_v10 = vpop.f32.mrb[24].mxu0 }
 0xf89   :  { %v1185_v33 = vadd.f32 %v1184_v10, %v2299_v58  ;;  %v1951_v13 = vpop.f32.mrb[25].mxu0  ;;  %v1015_v34 = vsel %vm264_vm2, %v1009_v30, -inf }
 0xf8a   :  { %1016 = vmax.xlane.f32.xlu1 %v1015_v34  ;;  %v1187_v35 = vpop.f32.mrb[26].mxu0 }
 0xf8b   :  { %v1952_v36 = vpop.f32.mrb[27].mxu0  ;;  %v1188_v38 = vadd.f32 %v1187_v35, %v2304_v60  ;;  %v1191_v39 = vsel %vm264_vm2, %v1185_v33, -inf }
 0xf8d   :  { %v1194_v41 = vsel %vm264_vm2, %v1188_v38, -inf }
 0xf8e   :  { %1192 = vmax.xlane.f32.xlu1 %v1191_v39 }
 0xf92   :  { %1195 = vmax.xlane.f32.xlu1 %v1194_v41 }
0x1015   :  { %v1014_v42 = vpop.xlane.xlu0 %1013 }
0x1016   :  { %v1018_v43 = vsub.f32 %v1006_v25, %v1014_v42 }
0x1017   :  { %v1017_v16 = vpop.xlane.xlu1 %1016 }
0x1018   :  { %v1020_v44 = vmul.f32 1.442695, %v1018_v43  ;;  %v1019_v46 = vsub.f32 %v1009_v30, %v1017_v16 }
0x101a   :  { %2093 = vpow2.f32 %v1020_v44  ;;  %v1022_v58 = vmul.f32 1.442695, %v1019_v46 }
0x101b   :  { %v1193_v24 = vpop.xlane.xlu1 %1192 }
0x101c   :  { %2095 = vpow2.f32 %v1022_v58  ;;  %v1197_v47 = vsub.f32 %v1185_v33, %v1193_v24 }
0x101e   :  { %v1199_v27 = vmul.f32 1.442695, %v1197_v47 }
0x101f   :  { %v1196_v26 = vpop.xlane.xlu1 %1195 }
0x1020   :  { %2097 = vpow2.f32 %v1199_v27  ;;  %v1198_v60 = vsub.f32 %v1188_v38, %v1196_v26 }
0x1022   :  { %v1201_v48 = vmul.f32 1.442695, %v1198_v60 }
0x1024   :  { %v2094_v28 = vpop.eup %2093  ;;  %2099 = vpow2.f32 %v1201_v48 }
0x1025   :  { %v1024_v52 = vsel %vm264_vm2, %v2094_v28, 0.0 }
0x1026   :  { %v2096_v53 = vpop.eup %2095  ;;  %1025 = vadd.xlane.f32.xlu0 %v1024_v52 }
0x1027   :  { %v1027_v54 = vsel %vm264_vm2, %v2096_v53, 0.0 }
0x102a   :  { %v2098_v55 = vpop.eup %2097  ;;  %1028 = vadd.xlane.f32.xlu0 %v1027_v54 }
0x102b   :  { %v1203_v56 = vsel %vm264_vm2, %v2098_v55, 0.0 }
0x102c   :  { %1204 = vadd.xlane.f32.xlu1 %v1203_v56 }
0x102e   :  { %v2100_v57 = vpop.eup %2099 }
0x102f   :  { %v1206_v59 = vsel %vm264_vm2, %v2100_v57, 0.0 }
0x1030   :  { %1207 = vadd.xlane.f32.xlu1 %v1206_v59  ;;  %v2052_v59 = vld [vmem:[%s2658_s1 + $0x34] ss:$8 sps:$4 sm:$0xff]  }
0x1040   :  { %1035 = vrot.lane.b32.xlu0 %v2466_v17, %s2158_s21 }
0x1041   :  { %1083 = vrot.lane.b32.xlu1 %v2441_v50, %s2160_s23 }
0x1044   :  { %1214 = vrot.lane.b32.xlu0 %v2466_v17, %s2159_s22 }
0x1048   :  { %1262 = vrot.lane.b32.xlu0 %v2450_v51, %s2160_s23 }
0x10b3   :  { %v1026_v61 = vpop.xlane.xlu0 %1025 }
0x10b4   :  { %2101 = vrcp.f32 %v1026_v61 }
0x10b7   :  { %v1029_v62 = vpop.xlane.xlu0 %1028 }
0x10b8   :  { %2103 = vrcp.f32 %v1029_v62 }
0x10b9   :  { %v1205_v63 = vpop.xlane.xlu1 %1204 }
0x10ba   :  { %2105 = vrcp.f32 %v1205_v63 }
0x10bb   :  { %v1036_v0 = vpop.permute.xlu0 %1035 }
0x10bc   :  { %1936 = vmatpush3.bf16.msra.mxu1 %v1036_v0 }
0x10bd   :  { %v1208_v2 = vpop.xlane.xlu1 %1207  ;;  %1941 = vmatprep.subr.bf16.mxu1 %v2153_v1 }
0x10be   :  { %2107 = vrcp.f32 %v1208_v2  ;;  %v2102_v3 = vpop.eup %2101 }
0x10bf   :  { %v1032_v4 = vmul.f32 %v2102_v3, %v2094_v28  ;;  %v1215_v21 = vpop.permute.xlu0 %1214 }
0x10c1   :  { %v1084_v8 = vpop.permute.xlu1 %1083 }
0x10c2   :  { %v2104_v50 = vpop.eup %2103 }
0x10c3   :  { %v1033_v5 = vmul.f32 %v2104_v50, %v2096_v53  ;;  %v1263_v22 = vpop.permute.xlu0 %1262 }
0x10c4   :  { %v2106_v9 = vpop.eup %2105  ;;  %1960 = vmatpush3.bf16.msra.mxu0 %v1263_v22  ;;  %v2059_v22 = vld [vmem:[%s2659_s2 + $0xb0] sm:$0xff]  }
0x10c5   :  { %v1034_v6 = vpack.c.bf16 %v1033_v5, %v1032_v4  ;;  %v1211_v11 = vmul.f32 %v2106_v9, %v2098_v55  ;;  %1973 = vmatprep.subr.bf16.mxu0 %v2153_v1 }
0x10c7   :  { %1938 = vmatmul.mubr.msk.bf16.vlgmr.msra.gmra.mrb[24].mxu1 %vm264_vm2, %v1034_v6 }
0x10c8   :  { %v2108_v51 = vpop.eup %2107  ;;  %1942 = vmatpush3.bf16.msra.mxu1 %v1084_v8  ;;  %1943 = vmatprep.mubr.msk.bf16.mxu1 %vm2154_vm0, %v2153_v1 }
0x10c9   :  { %v1212_v12 = vmul.f32 %v2108_v51, %v2100_v57  ;;  %1953 = vmatprep.subr.bf16.mxu1 %v2153_v1  ;;  %v2051_v57 = vld [vmem:[%s2658_s1 + $0x24] ss:$8 sps:$4 sm:$0xff]  }
0x10cb   :  { %v1213_v14 = vpack.c.bf16 %v1212_v12, %v1211_v11 }
0x119a   :  { %v1075_v15 = vpop.f32.mrb[24].mxu1 }
0x119b   :  { %v1939_v17 = vpop.f32.mrb[25].mxu1 }
0x119c   :  { %v1078_v18 = vpop.f32.mrb[26].mxu1  ;;  %v2054_v17 = vld [vmem:[%s2659_s2 + $0x88] sm:$0xff]  }
0x119d   :  { %v1082_v19 = vpack.c.bf16 %v1078_v18, %v1075_v15  ;;  %v1940_v20 = vpop.f32.mrb[27].mxu1  ;;  %v2053_v15 = vld [vmem:[%s2659_s2 + $0x80] sm:$0xff]   ;;  %v2055_v18 = vld [vmem:[%s2659_s2 + $0x90] sm:$0xff]  }
0x119e   :  { %v2057_v20 = vld [vmem:[%s2659_s2 + $0xa0] sm:$0xff]  }
0x119f   :  { %1944 = vmatmul.mubr.msk.bf16.vlgmr.msra.gmra.mrb[28].mxu1 %vm264_vm2, %v1082_v19  ;;  %v2056_v19 = vld [vmem:[%s2659_s2 + $0x98] sm:$0xff]  }
0x11a0   :  { %1954 = vmatpush3.bf16.msra.mxu1 %v1215_v21  ;;  %1955 = vmatprep.mubr.msk.bf16.mxu1 %vm2154_vm0, %v2153_v1  ;;  %v2058_v21 = vld [vmem:[%s2659_s2 + $0xa8] sm:$0xff]  }
0x11a1   :  { %1965 = vmatprep.subr.bf16.mxu1 %v2153_v1 }
0x11a7   :  { %1956 = vmatmul.mubr.msk.bf16.vlgmr.msra.gmra.mrb[32].mxu1 %vm264_vm2, %v1213_v14 }
0x11a8   :  { %1969 = vmatprep.mubr.msk.bf16.mxu1 %vm2154_vm0, %v2153_v1  ;;  %1966 = vmatpush3.bf16.msra.mxu1 %v2051_v57 }
0x11a9   :  { %1967 = vmatprep.subr.bf16.mxu1 %v2153_v1 }
0x11ac   :  { %1968 = vmatpush3.bf16.msra.mxu1 %v2052_v59 }
0x11ad   :  { %1993 = vmatprep.subr.bf16.mxu1 %v2153_v1 }
0x1272   :  { %v1123_v23 = vpop.f32.mrb[28].mxu1 }
0x1273   :  { %1132 = vrot.lane.b32.xlu0 %v1123_v23, %s2155_s8  ;;  %v1945_v25 = vpop.f32.mrb[29].mxu1  ;;  %v2060_v23 = vld [vmem:[%s2659_s2 + $0xb8] sm:$0xff]  }
0x1274   :  { %v1126_v29 = vpop.f32.mrb[30].mxu1  ;;  %v1742_v25 = vld [vmem:[%s2660_s3 + $0x6] ss:$0 sm:$0xff] }
0x1275   :  { %1134 = vrot.lane.b32.xlu1 %v1126_v29, %s2155_s8  ;;  %v1946_v45 = vpop.f32.mrb[31].mxu1 }
0x127a   :  { %v1254_v30 = vpop.f32.mrb[32].mxu1 }
0x127b   :  { %v1957_v31 = vpop.f32.mrb[33].mxu1 }
0x127c   :  { %v1257_v32 = vpop.f32.mrb[34].mxu1 }
0x127d   :  { %v1261_v10 = vpack.c.bf16 %v1257_v32, %v1254_v30  ;;  %v1958_v33 = vpop.f32.mrb[35].mxu1 }
0x127f   :  { %1962 = vmatmul.mubr.msk.bf16.vlgmr.msra.gmra.mrb[28].mxu0 %vm264_vm2, %v1261_v10 }
0x1280   :  { %1989 = vmatprep.mubr.msk.bf16.mxu0 %vm2154_vm0, %v2153_v1  ;;  %1974 = vmatpush3.bf16.msra.mxu0 %v2053_v15 }
0x1281   :  { %1975 = vmatprep.subr.bf16.mxu0 %v2153_v1 }
0x1284   :  { %1976 = vmatpush3.bf16.msra.mxu0 %v2054_v17 }
0x1285   :  { %1977 = vmatprep.subr.bf16.mxu0 %v2153_v1 }
0x1288   :  { %1978 = vmatpush3.bf16.msra.mxu0 %v2055_v18  ;;  %v2126_v18 = vld [vmem:[%s2659_s2 + $0x28] sm:$0xff]  }
0x1289   :  { %1979 = vmatprep.subr.bf16.mxu0 %v2153_v1 }
0x128c   :  { %1980 = vmatpush3.bf16.msra.mxu0 %v2056_v19  ;;  %v1595_v19 = vsel %vm159_vm1, %v2126_v18, 0 }
0x128d   :  { %1981 = vmatprep.subr.bf16.mxu0 %v2153_v1 }
0x1290   :  { %1982 = vmatpush3.bf16.msra.mxu0 %v2057_v20  ;;  %v1755_v20 = vld [vmem:[%s2660_s3 + $0x8] ss:$0 sm:$0xff] }
0x1291   :  { %1983 = vmatprep.subr.bf16.mxu0 %v2153_v1 }
0x1294   :  { %1984 = vmatpush3.bf16.msra.mxu0 %v2058_v21  ;;  %v2127_v21 = vld [vmem:[%s2659_s2 + $0x30] sm:$0xff]  }
0x1295   :  { %1985 = vmatprep.subr.bf16.mxu0 %v2153_v1 }
0x1298   :  { %1986 = vmatpush3.bf16.msra.mxu0 %v2059_v22  ;;  %v1598_v22 = vsel %vm159_vm1, %v2127_v21, 0 }
0x1299   :  { %1987 = vmatprep.subr.bf16.mxu0 %v2153_v1 }
0x129c   :  { %1988 = vmatpush3.bf16.msra.mxu0 %v2060_v23  ;;  %v2128_v23 = vld [vmem:[%s2659_s2 + $0x38] sm:$0xff]  }
0x12e5   :  { %v1133_v38 = vpop.permute.xlu0 %1132 }
0x12e6   :  { %v1138_v41 = vadd.f32 %v2462_v7, %v1133_v38 }
0x12e7   :  { %v1135_v39 = vpop.permute.xlu1 %1134 }
0x12e8   :  { %v1139_v43 = vadd.f32 %v2462_v7, %v1135_v39 }
0x1352   :  { %v1302_v13 = vpop.f32.mrb[28].mxu0 }
0x1353   :  { %1311 = vrot.lane.b32.xlu0 %v1302_v13, %s2155_s8  ;;  %v1963_v34 = vpop.f32.mrb[29].mxu0 }
0x1354   :  { %v1305_v35 = vpop.f32.mrb[30].mxu0 }
0x1355   :  { %1313 = vrot.lane.b32.xlu1 %v1305_v35, %s2155_s8  ;;  %v1964_v36 = vpop.f32.mrb[31].mxu0 }
0x13c5   :  { %v1312_v42 = vpop.permute.xlu0 %1311 }
0x13c6   :  { %v1317_v16 = vadd.f32 %v1312_v42, %v1138_v41 }
0x13c7   :  { %v1314_v44 = vpop.permute.xlu1 %1313 }
0x13c8   :  { %v1318_v46 = vadd.f32 %v1314_v44, %v1139_v43  ;;  %1321 = vrot.lane.b32.xlu0 %v1317_v16, %s2160_s23 }
0x13ca   :  { %1323 = vrot.lane.b32.xlu1 %v1318_v46, %s2160_s23 }
0x143a   :  { %v1322_v58 = vpop.permute.xlu0 %1321 }
0x143b   :  { %v2530_v24 = vadd.f32 %v1322_v58, %v2420_v37 }
0x143c   :  { %v1324_v47 = vpop.permute.xlu1 %1323 }
0x143d   :  { %v2533_v27 = vadd.f32 %v1324_v47, %v2423_v40  ;;  %v1329_v26 = vsel %vm159_vm1, %v2530_v24, 0.0 }
0x143e   :  { %1330 = vadd.xlane.f32.xlu0 %v1329_v26 }
0x143f   :  { %v1332_v7 = vsel %vm159_vm1, %v2533_v27, 0.0 }
0x1440   :  { %1333 = vadd.xlane.f32.xlu1 %v1332_v7 }
0x1451   :  { %1360 = vrot.lane.b32.xlu1 %v2436_v49, %s2160_s23 }
0x14cb   :  { %v1331_v60 = vpop.xlane.xlu0 %1330 }
0x14cc   :  { %v1335_v48 = vmul.f32 0.03125, %v1331_v60 }
0x14cd   :  { %v1334_v28 = vpop.xlane.xlu1 %1333 }
0x14ce   :  { %v1337_v37 = vsub.f32 %v2530_v24, %v1335_v48  ;;  %v1336_v52 = vmul.f32 0.03125, %v1334_v28  ;;  %v1746_v28 = vld [vmem:[%s2660_s3 + $0x7] ss:$0 sm:$0xff] }
0x14d0   :  { %v1338_v40 = vsub.f32 %v2533_v27, %v1336_v52  ;;  %v1339_v53 = vmul.f32 %v1337_v37, %v1337_v37 }
0x14d1   :  { %v1361_v9 = vpop.permute.xlu1 %1360 }
0x14d2   :  { %v1341_v54 = vsel %vm159_vm1, %v1339_v53, 0.0  ;;  %v1340_v55 = vmul.f32 %v1338_v40, %v1338_v40 }
0x14d3   :  { %1342 = vadd.xlane.f32.xlu0 %v1341_v54 }
0x14d4   :  { %v1344_v56 = vsel %vm159_vm1, %v1340_v55, 0.0 }
0x14d7   :  { %1345 = vadd.xlane.f32.xlu0 %v1344_v56 }
0x14ed   :  { %1355 = vrot.lane.b32.xlu0 %v2436_v49, %s2158_s21 }
0x1560   :  { %v1343_v61 = vpop.xlane.xlu0 %1342 }
0x1561   :  { %v1347_v62 = vmul.f32 0.03125, %v1343_v61 }
0x1563   :  { %v1349_v63 = vadd.f32 1e-05, %v1347_v62  ;;  %v2121_v62 = vld [vmem:[%s2659_s2] sm:$0xff]  }
0x1564   :  { %v1346_v0 = vpop.xlane.xlu0 %1345 }
0x1565   :  { %2109 = vrsqrt.f32 %v1349_v63  ;;  %v1348_v49 = vmul.f32 0.03125, %v1346_v0  ;;  %v1580_v63 = vsel %vm159_vm1, %v2121_v62, 0 }
0x1567   :  { %v1350_v2 = vadd.f32 1e-05, %v1348_v49 }
0x1568   :  { %v1356_v4 = vpop.permute.xlu0 %1355 }
0x1569   :  { %2111 = vrsqrt.f32 %v1350_v2  ;;  %v2124_v2 = vld [vmem:[%s2659_s2 + $0x18] sm:$0xff]  }
0x156f   :  { %v2110_v3 = vpop.eup %2109 }
0x1570   :  { %v1353_v50 = vmul.f32 %v2110_v3, %v1337_v37  ;;  %v1589_v3 = vsel %vm159_vm1, %v2124_v2, 0 }
0x1572   :  { %v1358_v8 = vmul.f32 %v1356_v4, %v1353_v50  ;;  %v2125_v50 = vld [vmem:[%s2659_s2 + $0x20] sm:$0xff]  }
0x1573   :  { %v2112_v5 = vpop.eup %2111 }
0x1574   :  { %v1354_v6 = vmul.f32 %v2112_v5, %v1338_v40  ;;  %v1363_v11 = vadd.f32 %v1361_v9, %v1358_v8 }
0x1576   :  { %v1359_v51 = vmul.f32 %v1356_v4, %v1354_v6  ;;  %v1592_v4 = vsel %vm159_vm1, %v2125_v50, 0 }
0x1578   :  { %v1364_v12 = vadd.f32 %v1361_v9, %v1359_v51 }
0x157a   :  { %v1365_v14 = vpack.c.bf16 %v1364_v12, %v1363_v11 }
0x157c   :  { %1970 = vmatmul.mubr.msk.bf16.vlgmr.msra.gmra.mrb[36].mxu1 %vm159_vm1, %v1365_v14 }
0x157d   :  { %2009 = vmatprep.mubr.msk.bf16.mxu1 %vm2154_vm0, %v2153_v1  ;;  %1994 = vmatpush3.bf16.xpose.msra.mxu1 %v1580_v63 }
0x157e   :  { %1995 = vmatprep.subr.bf16.mxu1 %v2153_v1 }
0x164f   :  { %v1415_v29 = vpop.f32.mrb[36].mxu1 }
0x1650   :  { %v1416_v45 = vadd.f32 %v1742_v25, %v1415_v29  ;;  %v1971_v30 = vpop.f32.mrb[37].mxu1 }
0x1651   :  { %v1418_v31 = vpop.f32.mrb[38].mxu1 }
0x1652   :  { %v1424_v32 = vmul.f32 0.044715, %v1416_v45  ;;  %v1419_v10 = vadd.f32 %v1742_v25, %v1418_v31  ;;  %v1972_v33 = vpop.f32.mrb[39].mxu1  ;;  %v1422_v58 = vmul.f32 0.5, %v1416_v45  ;;  %v1601_v25 = vsel %vm159_vm1, %v2128_v23, 0 }
0x1654   :  { %v1426_v13 = vmul.f32 %v1424_v32, %v1416_v45  ;;  %v1425_v34 = vmul.f32 0.044715, %v1419_v10  ;;  %v1423_v47 = vmul.f32 0.5, %v1419_v10 }
0x1656   :  { %v1428_v35 = vmul.f32 %v1426_v13, %v1416_v45  ;;  %v1427_v36 = vmul.f32 %v1425_v34, %v1419_v10 }
0x1658   :  { %v1430_v38 = vadd.f32 %v1428_v35, %v1416_v45  ;;  %v1429_v39 = vmul.f32 %v1427_v36, %v1419_v10 }
0x165a   :  { %v1432_v41 = vmul.f32 0.7978846, %v1430_v38  ;;  %v1431_v42 = vadd.f32 %v1429_v39, %v1419_v10 }
0x165c   :  { %2113 = vtanh.f32 %v1432_v41  ;;  %v1433_v43 = vmul.f32 0.7978846, %v1431_v42 }
0x165e   :  { %2115 = vtanh.f32 %v1433_v43 }
0x1666   :  { %v2114_v16 = vpop.eup %2113 }
0x1667   :  { %v1436_v44 = vadd.f32 1.0, %v2114_v16 }
0x1668   :  { %v2116_v46 = vpop.eup %2115 }
0x1669   :  { %v1437_v26 = vadd.f32 1.0, %v2116_v46  ;;  %v1438_v7 = vmul.f32 %v1436_v44, %v1422_v58 }
0x166b   :  { %v1439_v60 = vmul.f32 %v1437_v26, %v1423_v47 }
0x166d   :  { %v1440_v48 = vpack.c.bf16 %v1439_v60, %v1438_v7 }
0x166f   :  { %1990 = vmatmul.mubr.bf16.vlgmr.msra.gmra.mrb[32].mxu0 %v1440_v48 }
0x1742   :  { %v1527_v37 = vpop.f32.mrb[32].mxu0 }
0x1743   :  { %v1528_v52 = vadd.f32 %v1746_v28, %v1527_v37  ;;  %v1991_v40 = vpop.f32.mrb[33].mxu0 }
0x1744   :  { %v1530_v53 = vpop.f32.mrb[34].mxu0 }
0x1745   :  { %v1531_v54 = vadd.f32 %v1746_v28, %v1530_v53  ;;  %v1992_v55 = vpop.f32.mrb[35].mxu0  ;;  %v1534_v56 = vadd.f32 %v1528_v52, %v2530_v24  ;;  %v2122_v24 = vld [vmem:[%s2659_s2 + $0x8] sm:$0xff]  }
0x1746   :  { %v1583_v0 = vsel %vm159_vm1, %v2122_v24, 0 }
0x1747   :  { %v1537_v57 = vsel %vm159_vm1, %v1534_v56, 0.0  ;;  %v1535_v59 = vadd.f32 %v1531_v54, %v2533_v27  ;;  %1996 = vmatpush3.bf16.xpose.msra.mxu1 %v1583_v0  ;;  %v2123_v27 = vld [vmem:[%s2659_s2 + $0x10] sm:$0xff]   ;;  %s2161_s2 = smov [#allocation2]  }
0x1748   :  { %1538 = vadd.xlane.f32.xlu1 %v1537_v57  ;;  %1997 = vmatprep.subr.bf16.mxu1 %v2153_v1  ;;  %v1586_v49 = vsel %vm159_vm1, %v2123_v27, 0  ;;  %s1651_s3 = sshll.u32 %s2161_s2, 4  ;;  %s1652_s3 = int_to_ptr.vmem [resolvable:$true] %s1651_s3 }
0x1749   :  { %v1540_v61 = vsel %vm159_vm1, %v1535_v59, 0.0  ;;  %p2134_p1 = scmp.lt.s32.totalorder %s1652_s3, %s1652_s3 }
0x174a   :  { %1541 = vadd.xlane.f32.xlu0 %v1540_v61 }
0x174f   :  { %1998 = vmatpush3.bf16.xpose.msra.mxu1 %v1586_v49 }
0x1750   :  { %1999 = vmatprep.subr.bf16.mxu1 %v2153_v1 }
0x1757   :  { %2000 = vmatpush3.bf16.xpose.msra.mxu1 %v1589_v3 }
0x1758   :  { %2001 = vmatprep.subr.bf16.mxu1 %v2153_v1 }
0x175f   :  { %2002 = vmatpush3.bf16.xpose.msra.mxu1 %v1592_v4 }
0x1760   :  { %2003 = vmatprep.subr.bf16.mxu1 %v2153_v1 }
0x1767   :  { %2004 = vmatpush3.bf16.xpose.msra.mxu1 %v1595_v19 }
0x1768   :  { %2005 = vmatprep.subr.bf16.mxu1 %v2153_v1 }
0x176f   :  { %2006 = vmatpush3.bf16.xpose.msra.mxu1 %v1598_v22 }
0x1770   :  { %2007 = vmatprep.subr.bf16.mxu1 %v2153_v1 }
0x1777   :  { %2008 = vmatpush3.bf16.xpose.msra.mxu1 %v1601_v25 }
0x17d5   :  { %v1539_v5 = vpop.xlane.xlu1 %1538 }
0x17d6   :  { %v1543_v6 = vmul.f32 0.03125, %v1539_v5 }
0x17d7   :  { %v1542_v8 = vpop.xlane.xlu0 %1541 }
0x17d8   :  { %v1545_v9 = vsub.f32 %v1534_v56, %v1543_v6  ;;  %v1544_v51 = vmul.f32 0.03125, %v1542_v8 }
0x17da   :  { %v1546_v11 = vsub.f32 %v1535_v59, %v1544_v51  ;;  %v1547_v12 = vmul.f32 %v1545_v9, %v1545_v9 }
0x17dc   :  { %v1549_v14 = vsel %vm159_vm1, %v1547_v12, 0.0  ;;  %v1548_v15 = vmul.f32 %v1546_v11, %v1546_v11 }
0x17dd   :  { %1550 = vadd.xlane.f32.xlu0 %v1549_v14 }
0x17de   :  { %v1552_v17 = vsel %vm159_vm1, %v1548_v15, 0.0 }
0x17df   :  { %1553 = vadd.xlane.f32.xlu1 %v1552_v17 }
0x17f3   :  { %1570 = vrot.lane.b32.xlu0 %v1755_v20, %s2155_s8  ;;  %s2129_s8 = scalar_lea.vmem %s1652_s3, 256 }
0x17f4   :  { %p2130_p0 = scmp.ne.s32.totalorder %s1652_s3, %s2129_s8  ;;  %p2135_p2 = scmp.lt.s32.totalorder %s2129_s8, %s2129_s8 }
0x17f6   :  { %p2136_p3 = por %p2135_p2, %p2134_p1 }
0x17f8   :  { %p2137_p4 = pnand %p2136_p3, %p2130_p0 }
0x186a   :  { %v1551_v29 = vpop.xlane.xlu0 %1550 }
0x186b   :  { %v1555_v45 = vmul.f32 0.03125, %v1551_v29 }
0x186c   :  { %v1554_v30 = vpop.xlane.xlu1 %1553 }
0x186d   :  { %v1557_v31 = vadd.f32 1e-05, %v1555_v45  ;;  %v1556_v32 = vmul.f32 0.03125, %v1554_v30 }
0x186e   :  { %v1571_v36 = vpop.permute.xlu0 %1570 }
0x186f   :  { %2117 = vrsqrt.f32 %v1557_v31  ;;  %v1558_v10 = vadd.f32 1e-05, %v1556_v32 }
0x1871   :  { %2119 = vrsqrt.f32 %v1558_v10 }
0x1879   :  { %v2118_v33 = vpop.eup %2117 }
0x187a   :  { %v1561_v13 = vmul.f32 %v2118_v33, %v1545_v9 }
0x187b   :  { %v2120_v34 = vpop.eup %2119 }
0x187c   :  { %v1562_v35 = vmul.f32 %v2120_v34, %v1546_v11  ;;  %v1567_v1 = vmul.f32 %v1755_v20, %v1561_v13 }
0x187e   :  { %v1568_v38 = vmul.f32 %v1755_v20, %v1562_v35  ;;  %v1573_v39 = vadd.f32 %v1571_v36, %v1567_v1 }
0x1880   :  { %v1574_v41 = vadd.f32 %v1571_v36, %v1568_v38 }
0x1882   :  { %v1575_v42 = vpack.c.bf16 %v1574_v41, %v1573_v39 }
0x1884   :  { %2010 = vmatmul.mubr.msk.bf16.vlgmr.msra.gmra.mrb[40].mxu1 %vm159_vm1, %v1575_v42 }
0x1957   :  { %v1637_v43 = vpop.f32.mrb[40].mxu1 }
0x1958   :  { %1644 = vst [vmem:[#allocation2] sm:$0xff] %v1637_v43  ;;  %v2011_v16 = vpop.f32.mrb[41].mxu1 }
0x1959   :  { %v1640_v44 = vpop.f32.mrb[42].mxu1 }
0x195a   :  { %1645 = vst [vmem:[#allocation2 + $0x8] sm:$0xff] %v1640_v44  ;;  %v2012_v46 = vpop.f32.mrb[43].mxu1 }
0x195b   :  { %2140 = shalt.err (!%p2137_p4)
}
0x195c   :  { %s2141_s25 = scalar_lea.hbm %s2661_s4, 256 }
0x195d   :  { %p2142_p5 = scmp.ne.s32.totalorder %s2661_s4, %s2141_s25  ;;  %p2145_p6 = scmp.lt.u32.totalorder %s2141_s25, %s2661_s4 }
0x195f   :  { %p2147_p7 = pnand %p2145_p6, %p2142_p5 }
0x1961   :  { %2150 = shalt.err (!%p2147_p7)
}
0x1962   :  { %s2162_s30 = smov 128   ;;  %s2163_s5 = smov 8  }
0x1963   :  { %1657 = dma.vmem_to_hbm [thread:$0]  %s1652_s3, 256, %s2661_s4, [#allocation3], %s2162_s30, %s2162_s30, %s2163_s5  }
0x1964   :  { %2151 = dma.done.wait [#allocation3], 256  }
0x1965   :  { %2152 = vsyncadd [#allocation3], 4294967040 }
0x1966   :  { %1661 = vsyncpa [#allocation3], 1 }

</bundles_post_ra>
